<compile_context>
chip_gen: v5e
topology: v5e:2x2
jax: 0.10.0
libtpu: 0.0.40
codegen_flags: <defaults>
</compile_context>

<pallas_src>
import math
from functools import partial

import jax
import jax.numpy as jnp
from jax.experimental import pallas as pl
from jax.experimental.pallas import tpu as pltpu

# ----- model hyper-params (scaled down from 768/12/3072/6 for a small demo) --
D = 128          # hidden size
H = 4            # attention heads
DH = D // H      # per-head dim
FF = 256         # FFN inner size
LAYERS = 2       # transformer layers
VOCAB = 64
MAX_POS = 32
LN_EPS = 1e-12   # DistilBERT LayerNorm eps
NEG_INF = float(jnp.finfo(jnp.float32).min)
HEAD_PAD = 128   # lane-dense padded width of the classifier head output


# -------------------------- in-kernel helpers --------------------------------
def _ln(x, g, b):
    """LayerNorm over the last axis, f32 statistics."""
    mu = jnp.mean(x, axis=-1, keepdims=True)
    var = jnp.mean(jnp.square(x - mu), axis=-1, keepdims=True)
    inv = jax.lax.rsqrt(var + LN_EPS)
    return (x - mu) * inv * g + b


def _gelu(x):
    # TODO(synk): HF DistilBERT uses exact (erf) GELU; tanh approximation used here.
    c = math.sqrt(2.0 / math.pi)
    return 0.5 * x * (1.0 + jnp.tanh(c * (x + 0.044715 * x * x * x)))


# -------------------------- fused encoder kernel -----------------------------
def _encoder_kernel(emb_ref, mask_ref, emb_g_ref, emb_b_ref,
                    qkv_w_ref, qkv_b_ref, o_w_ref, o_b_ref, sa_g_ref, sa_b_ref,
                    ff1_w_ref, ff1_b_ref, ff2_w_ref, ff2_b_ref,
                    out_g_ref, out_b_ref, fc_w_ref, fc_b_ref,
                    out_ref, h_ref, *, batch, seqlen):
    """One grid step == one transformer layer; h lives in VMEM scratch."""
    l = pl.program_id(0)

    # --- layer 0: embedding LayerNorm (no residual, no zeros array) ---
    @pl.when(l == 0)
    def _():
        h_ref[...] = _ln(emb_ref[...], emb_g_ref[...], emb_b_ref[...])

    h = h_ref[...]                                         # (B*S, D) f32
    h_bf = h.astype(jnp.bfloat16)

    # --- fused QKV projection: (B*S, 3D), f32 accumulation ---
    qkv = jnp.dot(h_bf, qkv_w_ref[0],
                  preferred_element_type=jnp.float32) + qkv_b_ref[0]

    # --- multi-head self-attention (per batch, heads on the lane axis) ---
    scale = 1.0 / math.sqrt(DH)
    ctx_rows = []
    for b in range(batch):
        rows = slice(b * seqlen, (b + 1) * seqlen)
        m = mask_ref[b]                                    # (1, S) in {0,1}
        head_ctx = []
        for hh in range(H):
            c0 = hh * DH
            q_bh = qkv[rows, c0:c0 + DH].astype(jnp.bfloat16)              # (S, DH)
            k_bh = qkv[rows, D + c0:D + c0 + DH].astype(jnp.bfloat16)      # (S, DH)
            v_bh = qkv[rows, 2 * D + c0:2 * D + c0 + DH].astype(jnp.bfloat16)
            # scores: contract last dims (no k.T materialization)
            s = jax.lax.dot_general(q_bh, k_bh, (((1,), (1,)), ((), ())),
                                    preferred_element_type=jnp.float32) * scale
            s = jnp.where(m > 0.0, s, NEG_INF)             # masked_fill(mask==0, min)
            s_max = jnp.max(s, axis=-1, keepdims=True)
            p = jnp.exp(s - s_max)
            denom = jnp.sum(p, axis=-1, keepdims=True)
            p = p * pl.reciprocal(denom, approx=True)      # EUP slot, not VPU divide
            head_ctx.append(jnp.dot(p.astype(jnp.bfloat16), v_bh,
                                    preferred_element_type=jnp.float32))
        ctx_rows.append(jnp.concatenate(head_ctx, axis=-1))                # (S, D)
    ctx = jnp.concatenate(ctx_rows, axis=0)                                # (B*S, D)

    # --- output projection fused with add + LayerNorm ---
    attn_out = jnp.dot(ctx.astype(jnp.bfloat16), o_w_ref[0],
                       preferred_element_type=jnp.float32) + o_b_ref[0]
    h = _ln(attn_out + h, sa_g_ref[0], sa_b_ref[0])

    # --- feed-forward (gelu) fused with add + LayerNorm ---
    ff = jnp.dot(h.astype(jnp.bfloat16), ff1_w_ref[0],
                 preferred_element_type=jnp.float32) + ff1_b_ref[0]
    ff = _gelu(ff)
    ff2 = jnp.dot(ff.astype(jnp.bfloat16), ff2_w_ref[0],
                  preferred_element_type=jnp.float32) + ff2_b_ref[0]
    h = _ln(ff2 + h, out_g_ref[0], out_b_ref[0])
    h_ref[...] = h

    # --- last layer: CLS token -> dropout(identity) -> fc(D -> 1), padded to 128 lanes ---
    @pl.when(l == pl.num_programs(0) - 1)
    def _():
        cls = jnp.concatenate([h[b * seqlen:b * seqlen + 1, :] for b in range(batch)],
                              axis=0)                                      # (B, D)
        out_ref[...] = jnp.dot(cls.astype(jnp.bfloat16), fc_w_ref[...],
                               preferred_element_type=jnp.float32) + fc_b_ref[...]


# -------------------------- parameters ---------------------------------------
def init_params(key):
    ks = iter(jax.random.split(key, 128))

    def nrm(shape, scale=0.02):
        return scale * jax.random.normal(next(ks), shape, dtype=jnp.float32)

    q_w, k_w, v_w, o_w, ff1_w, ff2_w = [], [], [], [], [], []
    for _ in range(LAYERS):
        q_w.append(nrm((D, D))); k_w.append(nrm((D, D))); v_w.append(nrm((D, D)))
        o_w.append(nrm((D, D)))
        ff1_w.append(nrm((D, FF))); ff2_w.append(nrm((FF, D)))

    qkv_w = jnp.stack([jnp.concatenate([q, k, v], axis=1)
                       for q, k, v in zip(q_w, k_w, v_w)], axis=0)         # (L, D, 3D)

    fc_w = nrm((D, 1))
    fc_w_pad = jnp.zeros((D, HEAD_PAD), jnp.float32).at[:, 0:1].set(fc_w)
    fc_b_pad = jnp.zeros((1, HEAD_PAD), jnp.float32)

    params = {
        "word_emb": nrm((VOCAB, D)),
        "pos_emb": nrm((MAX_POS, D)),
        "emb_ln_g": jnp.ones((1, D), jnp.float32),
        "emb_ln_b": jnp.zeros((1, D), jnp.float32),
        # stacked, bf16 matmul weights / f32 biases & LN params
        "qkv_w": qkv_w.astype(jnp.bfloat16),
        "qkv_b": jnp.zeros((LAYERS, 1, 3 * D), jnp.float32),
        "o_w": jnp.stack(o_w).astype(jnp.bfloat16),
        "o_b": jnp.zeros((LAYERS, 1, D), jnp.float32),
        "sa_ln_g": jnp.ones((LAYERS, 1, D), jnp.float32),
        "sa_ln_b": jnp.zeros((LAYERS, 1, D), jnp.float32),
        "ff1_w": jnp.stack(ff1_w).astype(jnp.bfloat16),
        "ff1_b": jnp.zeros((LAYERS, 1, FF), jnp.float32),
        "ff2_w": jnp.stack(ff2_w).astype(jnp.bfloat16),
        "ff2_b": jnp.zeros((LAYERS, 1, D), jnp.float32),
        "out_ln_g": jnp.ones((LAYERS, 1, D), jnp.float32),
        "out_ln_b": jnp.zeros((LAYERS, 1, D), jnp.float32),
        "fc_w_pad": fc_w_pad.astype(jnp.bfloat16),
        "fc_b_pad": fc_b_pad,
    }
    return params


# -------------------------- forward ------------------------------------------
def bert_architecture_forward(params, sent_id, mask):
    """Mirrors BERTArchitecture.forward(sent_id, mask) -> (B, 1) logits."""
    B_, S_ = sent_id.shape
    # Embedding lookup (glue: gather) + learned positional embeddings
    tok = jnp.take(params["word_emb"], sent_id, axis=0)        # (B, S, D)
    pos = params["pos_emb"][:S_][None, :, :]                   # (1, S, D)
    emb = (tok + pos).reshape(B_ * S_, D).astype(jnp.float32)
    mask3 = mask.astype(jnp.float32).reshape(B_, 1, S_)
    # TODO(synk): nn.Dropout(0.1) is identity at inference time.

    kernel = partial(_encoder_kernel, batch=B_, seqlen=S_)
    per_layer = lambda l: (l, 0, 0)     # noqa: E731 — stacked weights, double-buffered
    shared2 = lambda l: (0, 0)          # noqa: E731

    out_pad = pl.pallas_call(
        kernel,
        out_shape=jax.ShapeDtypeStruct((B_, HEAD_PAD), jnp.float32),
        grid=(LAYERS,),
        in_specs=[
            pl.BlockSpec((B_ * S_, D), shared2),                 # emb
            pl.BlockSpec((B_, 1, S_), lambda l: (0, 0, 0)),      # mask
            pl.BlockSpec((1, D), shared2),                       # emb_ln_g
            pl.BlockSpec((1, D), shared2),                       # emb_ln_b
            pl.BlockSpec((1, D, 3 * D), per_layer),              # qkv_w
            pl.BlockSpec((1, 1, 3 * D), per_layer),              # qkv_b
            pl.BlockSpec((1, D, D), per_layer),                  # o_w
            pl.BlockSpec((1, 1, D), per_layer),                  # o_b
            pl.BlockSpec((1, 1, D), per_layer),                  # sa_ln_g
            pl.BlockSpec((1, 1, D), per_layer),                  # sa_ln_b
            pl.BlockSpec((1, D, FF), per_layer),                 # ff1_w
            pl.BlockSpec((1, 1, FF), per_layer),                 # ff1_b
            pl.BlockSpec((1, FF, D), per_layer),                 # ff2_w
            pl.BlockSpec((1, 1, D), per_layer),                  # ff2_b
            pl.BlockSpec((1, 1, D), per_layer),                  # out_ln_g
            pl.BlockSpec((1, 1, D), per_layer),                  # out_ln_b
            pl.BlockSpec((D, HEAD_PAD), shared2),                # fc_w (padded)
            pl.BlockSpec((1, HEAD_PAD), shared2),                # fc_b (padded)
        ],
        out_specs=pl.BlockSpec((B_, HEAD_PAD), shared2),
        scratch_shapes=[pltpu.VMEM((B_ * S_, D), jnp.float32)],  # resident hidden state
        compiler_params=pltpu.CompilerParams(
            dimension_semantics=("arbitrary",)),                 # layer loop is sequential
    )(emb, mask3,
      params["emb_ln_g"], params["emb_ln_b"],
      params["qkv_w"], params["qkv_b"],
      params["o_w"], params["o_b"],
      params["sa_ln_g"], params["sa_ln_b"],
      params["ff1_w"], params["ff1_b"],
      params["ff2_w"], params["ff2_b"],
      params["out_ln_g"], params["out_ln_b"],
      params["fc_w_pad"], params["fc_b_pad"])

    return out_pad[:, :1]                                        # (B, 1)


if __name__ == "__main__":
    key = jax.random.PRNGKey(0)
    pkey, ikey = jax.random.split(key)
    params = init_params(pkey)

    B, S = 2, 8
    sent_id = jax.random.randint(ikey, (B, S), 0, VOCAB, dtype=jnp.int32)
    mask = jnp.ones((B, S), jnp.float32).at[1, 6:].set(0.0)   # pad last 2 tokens of ex. 1

    out = bert_architecture_forward(params, sent_id, mask)
    out = jax.block_until_ready(out)
    assert out.shape == (B, 1) and out.dtype == jnp.float32
    print("KERNEL_OK")
</pallas_src>

<mosaic_0001>
module attributes {stable_mosaic.version = 11 : i64} {
  func.func @_encoder_kernel(%arg0: i32, %arg1: memref<16x128xf32, #tpu.memory_space<vmem>>, %arg2: memref<2x1x8xf32, #tpu.memory_space<vmem>>, %arg3: memref<1x128xf32, #tpu.memory_space<vmem>>, %arg4: memref<1x128xf32, #tpu.memory_space<vmem>>, %arg5: memref<1x128x384xbf16, #tpu.memory_space<vmem>>, %arg6: memref<1x1x384xf32, #tpu.memory_space<vmem>>, %arg7: memref<1x128x128xbf16, #tpu.memory_space<vmem>>, %arg8: memref<1x1x128xf32, #tpu.memory_space<vmem>>, %arg9: memref<1x1x128xf32, #tpu.memory_space<vmem>>, %arg10: memref<1x1x128xf32, #tpu.memory_space<vmem>>, %arg11: memref<1x128x256xbf16, #tpu.memory_space<vmem>>, %arg12: memref<1x1x256xf32, #tpu.memory_space<vmem>>, %arg13: memref<1x256x128xbf16, #tpu.memory_space<vmem>>, %arg14: memref<1x1x128xf32, #tpu.memory_space<vmem>>, %arg15: memref<1x1x128xf32, #tpu.memory_space<vmem>>, %arg16: memref<1x1x128xf32, #tpu.memory_space<vmem>>, %arg17: memref<128x128xbf16, #tpu.memory_space<vmem>>, %arg18: memref<1x128xf32, #tpu.memory_space<vmem>>, %arg19: memref<2x128xf32, #tpu.memory_space<vmem>>, %arg20: memref<16x128xf32, #tpu.memory_space<vmem>>) attributes {dimension_semantics = [#tpu.dimension_semantics<arbitrary>], iteration_bounds = array<i64: 2>, scalar_prefetch = 0 : i64, scratch_operands = 1 : i64, tpu.core_type = #tpu.core_type<tc>, window_params = [{pipeline_mode = #tpu.pipeline_mode<synchronous>, transform_indices = @transform_0, window_bounds = array<i64: 16, 128>}, {pipeline_mode = #tpu.pipeline_mode<synchronous>, transform_indices = @transform_1, window_bounds = array<i64: 2, 1, 8>}, {pipeline_mode = #tpu.pipeline_mode<synchronous>, transform_indices = @transform_2, window_bounds = array<i64: 1, 128>}, {pipeline_mode = #tpu.pipeline_mode<synchronous>, transform_indices = @transform_3, window_bounds = array<i64: 1, 128>}, {transform_indices = @transform_4, window_bounds = array<i64: 1, 128, 384>}, {transform_indices = @transform_5, window_bounds = array<i64: 1, 1, 384>}, {transform_indices = @transform_6, window_bounds = array<i64: 1, 128, 128>}, {transform_indices = @transform_7, window_bounds = array<i64: 1, 1, 128>}, {transform_indices = @transform_8, window_bounds = array<i64: 1, 1, 128>}, {transform_indices = @transform_9, window_bounds = array<i64: 1, 1, 128>}, {transform_indices = @transform_10, window_bounds = array<i64: 1, 128, 256>}, {transform_indices = @transform_11, window_bounds = array<i64: 1, 1, 256>}, {transform_indices = @transform_12, window_bounds = array<i64: 1, 256, 128>}, {transform_indices = @transform_13, window_bounds = array<i64: 1, 1, 128>}, {transform_indices = @transform_14, window_bounds = array<i64: 1, 1, 128>}, {transform_indices = @transform_15, window_bounds = array<i64: 1, 1, 128>}, {pipeline_mode = #tpu.pipeline_mode<synchronous>, transform_indices = @transform_16, window_bounds = array<i64: 128, 128>}, {pipeline_mode = #tpu.pipeline_mode<synchronous>, transform_indices = @transform_17, window_bounds = array<i64: 1, 128>}, {pipeline_mode = #tpu.pipeline_mode<synchronous>, transform_indices = @transform_18, window_bounds = array<i64: 2, 128>}]} {
    %c0_i32 = arith.constant 0 : i32
    %0 = arith.cmpi eq, %arg0, %c0_i32 : i32
    %1 = arith.extui %0 : i1 to i32
    %c0_i32_0 = arith.constant 0 : i32
    %2 = arith.cmpi ne, %1, %c0_i32_0 : i32
    scf.if %2 {
      %c0_119 = arith.constant 0 : index
      %c0_120 = arith.constant 0 : index
      %330 = vector.load %arg1[%c0_119, %c0_120] : memref<16x128xf32, #tpu.memory_space<vmem>>, vector<16x128xf32>
      %c0_121 = arith.constant 0 : index
      %c0_122 = arith.constant 0 : index
      %331 = vector.load %arg3[%c0_121, %c0_122] : memref<1x128xf32, #tpu.memory_space<vmem>>, vector<1x128xf32>
      %c0_123 = arith.constant 0 : index
      %c0_124 = arith.constant 0 : index
      %332 = vector.load %arg4[%c0_123, %c0_124] : memref<1x128xf32, #tpu.memory_space<vmem>>, vector<1x128xf32>
      %cst_125 = arith.constant dense<0.000000e+00> : vector<16xf32>
      %333 = vector.multi_reduction <add>, %330, %cst_125 [1] : vector<16x128xf32> to vector<16xf32>
      %334 = vector.shape_cast %333 : vector<16xf32> to vector<16x1xf32>
      %cst_126 = arith.constant 1.280000e+02 : f32
      %335 = vector.broadcast %cst_126 : f32 to vector<16x1xf32>
      %336 = arith.divf %334, %335 : vector<16x1xf32>
      %337 = vector.broadcast %336 : vector<16x1xf32> to vector<16x128xf32>
      %338 = arith.subf %330, %337 : vector<16x128xf32>
      %339 = arith.mulf %338, %338 : vector<16x128xf32>
      %cst_127 = arith.constant dense<0.000000e+00> : vector<16xf32>
      %340 = vector.multi_reduction <add>, %339, %cst_127 [1] : vector<16x128xf32> to vector<16xf32>
      %341 = vector.shape_cast %340 : vector<16xf32> to vector<16x1xf32>
      %cst_128 = arith.constant 1.280000e+02 : f32
      %342 = vector.broadcast %cst_128 : f32 to vector<16x1xf32>
      %343 = arith.divf %341, %342 : vector<16x1xf32>
      %cst_129 = arith.constant 9.99999996E-13 : f32
      %344 = vector.broadcast %cst_129 : f32 to vector<16x1xf32>
      %345 = arith.addf %343, %344 : vector<16x1xf32>
      %346 = math.rsqrt %345 : vector<16x1xf32>
      %347 = vector.broadcast %336 : vector<16x1xf32> to vector<16x128xf32>
      %348 = arith.subf %330, %347 : vector<16x128xf32>
      %349 = vector.broadcast %346 : vector<16x1xf32> to vector<16x128xf32>
      %350 = arith.mulf %348, %349 : vector<16x128xf32>
      %351 = vector.broadcast %331 : vector<1x128xf32> to vector<16x128xf32>
      %352 = arith.mulf %350, %351 : vector<16x128xf32>
      %353 = vector.broadcast %332 : vector<1x128xf32> to vector<16x128xf32>
      %354 = arith.addf %352, %353 : vector<16x128xf32>
      %c0_130 = arith.constant 0 : index
      %c0_131 = arith.constant 0 : index
      %355 = vector.load %arg20[%c0_130, %c0_131] : memref<16x128xf32, #tpu.memory_space<vmem>>, vector<16x128xf32>
      tpu.vector_store %arg20[%c0_130, %c0_131], %354 {strides = array<i32>} : memref<16x128xf32, #tpu.memory_space<vmem>>, vector<16x128xf32>,
    } else {
    }
    %c0 = arith.constant 0 : index
    %c0_1 = arith.constant 0 : index
    %3 = vector.load %arg20[%c0, %c0_1] : memref<16x128xf32, #tpu.memory_space<vmem>>, vector<16x128xf32>
    %4 = arith.truncf %3 : vector<16x128xf32> to vector<16x128xbf16>
    %c0_2 = arith.constant 0 : index
    %c0_3 = arith.constant 0 : index
    %c0_4 = arith.constant 0 : index
    %5 = vector.load %arg5[%c0_2, %c0_3, %c0_4] : memref<1x128x384xbf16, #tpu.memory_space<vmem>>, vector<1x128x384xbf16>
    %6 = vector.shape_cast %5 : vector<1x128x384xbf16> to vector<128x384xbf16>
    %cst = arith.constant dense<0.000000e+00> : vector<16x384xf32>
    %7 = tpu.matmul %4, %6, %cst {dimension_numbers = #tpu.dot_dimension_numbers<[1], [0], [0], [1], [0, 0, 1, 1], [], []>} : vector<16x128xbf16>, vector<128x384xbf16>, vector<16x384xf32> -> vector<16x384xf32>
    %c0_5 = arith.constant 0 : index
    %c0_6 = arith.constant 0 : index
    %c0_7 = arith.constant 0 : index
    %8 = vector.load %arg6[%c0_5, %c0_6, %c0_7] : memref<1x1x384xf32, #tpu.memory_space<vmem>>, vector<1x1x384xf32>
    %9 = vector.shape_cast %8 : vector<1x1x384xf32> to vector<1x384xf32>
    %10 = vector.broadcast %9 : vector<1x384xf32> to vector<16x384xf32>
    %11 = arith.addf %7, %10 : vector<16x384xf32>
    %c0_8 = arith.constant 0 : index
    %c0_9 = arith.constant 0 : index
    %c0_10 = arith.constant 0 : index
    %12 = vector.load %arg2[%c0_8, %c0_9, %c0_10] : memref<2x1x8xf32, #tpu.memory_space<vmem>>, vector<1x1x8xf32>
    %13 = vector.shape_cast %12 : vector<1x1x8xf32> to vector<1x8xf32>
    %14 = vector.extract_strided_slice %11 {offsets = [0, 0], sizes = [8, 32], strides = [1, 1]} : vector<16x384xf32> to vector<8x32xf32>
    %15 = arith.truncf %14 : vector<8x32xf32> to vector<8x32xbf16>
    %16 = vector.extract_strided_slice %11 {offsets = [0, 128], sizes = [8, 32], strides = [1, 1]} : vector<16x384xf32> to vector<8x32xf32>
    %17 = arith.truncf %16 : vector<8x32xf32> to vector<8x32xbf16>
    %18 = vector.extract_strided_slice %11 {offsets = [0, 256], sizes = [8, 32], strides = [1, 1]} : vector<16x384xf32> to vector<8x32xf32>
    %19 = arith.truncf %18 : vector<8x32xf32> to vector<8x32xbf16>
    %cst_11 = arith.constant dense<0.000000e+00> : vector<8x8xf32>
    %20 = tpu.matmul %15, %17, %cst_11 {dimension_numbers = #tpu.dot_dimension_numbers<[1], [1], [0], [0], [0, 0, 1, 0], [], []>} : vector<8x32xbf16>, vector<8x32xbf16>, vector<8x8xf32> -> vector<8x8xf32>
    %cst_12 = arith.constant 0.176776692 : f32
    %21 = vector.broadcast %cst_12 : f32 to vector<8x8xf32>
    %22 = arith.mulf %20, %21 : vector<8x8xf32>
    %cst_13 = arith.constant 0.000000e+00 : f32
    %23 = vector.broadcast %cst_13 : f32 to vector<1x8xf32>
    %24 = arith.cmpf ogt, %13, %23 : vector<1x8xf32>
    %cst_14 = arith.constant -3.40282347E+38 : f32
    %25 = vector.shape_cast %24 : vector<1x8xi1> to vector<1x8xi1>
    %26 = vector.broadcast %25 : vector<1x8xi1> to vector<8x8xi1>
    %27 = vector.broadcast %cst_14 : f32 to vector<8x8xf32>
    %28 = arith.select %26, %22, %27 : vector<8x8xi1>, vector<8x8xf32>
    %cst_15 = arith.constant dense<0xFF800000> : vector<8xf32>
    %29 = vector.multi_reduction <maximumf>, %28, %cst_15 [1] : vector<8x8xf32> to vector<8xf32>
    %30 = vector.shape_cast %29 : vector<8xf32> to vector<8x1xf32>
    %31 = vector.broadcast %30 : vector<8x1xf32> to vector<8x8xf32>
    %32 = arith.subf %28, %31 : vector<8x8xf32>
    %33 = math.exp %32 : vector<8x8xf32>
    %cst_16 = arith.constant dense<0.000000e+00> : vector<8xf32>
    %34 = vector.multi_reduction <add>, %33, %cst_16 [1] : vector<8x8xf32> to vector<8xf32>
    %35 = vector.shape_cast %34 : vector<8xf32> to vector<8x1xf32>
    %36 = tpu.reciprocal %35 {approx = true} : vector<8x1xf32> -> vector<8x1xf32>
    %37 = vector.broadcast %36 : vector<8x1xf32> to vector<8x8xf32>
    %38 = arith.mulf %33, %37 : vector<8x8xf32>
    %39 = arith.truncf %38 : vector<8x8xf32> to vector<8x8xbf16>
    %cst_17 = arith.constant dense<0.000000e+00> : vector<8x32xf32>
    %40 = tpu.matmul %39, %19, %cst_17 {dimension_numbers = #tpu.dot_dimension_numbers<[1], [0], [0], [1], [0, 0, 1, 1], [], []>} : vector<8x8xbf16>, vector<8x32xbf16>, vector<8x32xf32> -> vector<8x32xf32>
    %41 = vector.extract_strided_slice %11 {offsets = [0, 32], sizes = [8, 32], strides = [1, 1]} : vector<16x384xf32> to vector<8x32xf32>
    %42 = arith.truncf %41 : vector<8x32xf32> to vector<8x32xbf16>
    %43 = vector.extract_strided_slice %11 {offsets = [0, 160], sizes = [8, 32], strides = [1, 1]} : vector<16x384xf32> to vector<8x32xf32>
    %44 = arith.truncf %43 : vector<8x32xf32> to vector<8x32xbf16>
    %45 = vector.extract_strided_slice %11 {offsets = [0, 288], sizes = [8, 32], strides = [1, 1]} : vector<16x384xf32> to vector<8x32xf32>
    %46 = arith.truncf %45 : vector<8x32xf32> to vector<8x32xbf16>
    %cst_18 = arith.constant dense<0.000000e+00> : vector<8x8xf32>
    %47 = tpu.matmul %42, %44, %cst_18 {dimension_numbers = #tpu.dot_dimension_numbers<[1], [1], [0], [0], [0, 0, 1, 0], [], []>} : vector<8x32xbf16>, vector<8x32xbf16>, vector<8x8xf32> -> vector<8x8xf32>
    %cst_19 = arith.constant 0.176776692 : f32
    %48 = vector.broadcast %cst_19 : f32 to vector<8x8xf32>
    %49 = arith.mulf %47, %48 : vector<8x8xf32>
    %cst_20 = arith.constant 0.000000e+00 : f32
    %50 = vector.broadcast %cst_20 : f32 to vector<1x8xf32>
    %51 = arith.cmpf ogt, %13, %50 : vector<1x8xf32>
    %cst_21 = arith.constant -3.40282347E+38 : f32
    %52 = vector.shape_cast %51 : vector<1x8xi1> to vector<1x8xi1>
    %53 = vector.broadcast %52 : vector<1x8xi1> to vector<8x8xi1>
    %54 = vector.broadcast %cst_21 : f32 to vector<8x8xf32>
    %55 = arith.select %53, %49, %54 : vector<8x8xi1>, vector<8x8xf32>
    %cst_22 = arith.constant dense<0xFF800000> : vector<8xf32>
    %56 = vector.multi_reduction <maximumf>, %55, %cst_22 [1] : vector<8x8xf32> to vector<8xf32>
    %57 = vector.shape_cast %56 : vector<8xf32> to vector<8x1xf32>
    %58 = vector.broadcast %57 : vector<8x1xf32> to vector<8x8xf32>
    %59 = arith.subf %55, %58 : vector<8x8xf32>
    %60 = math.exp %59 : vector<8x8xf32>
    %cst_23 = arith.constant dense<0.000000e+00> : vector<8xf32>
    %61 = vector.multi_reduction <add>, %60, %cst_23 [1] : vector<8x8xf32> to vector<8xf32>
    %62 = vector.shape_cast %61 : vector<8xf32> to vector<8x1xf32>
    %63 = tpu.reciprocal %62 {approx = true} : vector<8x1xf32> -> vector<8x1xf32>
    %64 = vector.broadcast %63 : vector<8x1xf32> to vector<8x8xf32>
    %65 = arith.mulf %60, %64 : vector<8x8xf32>
    %66 = arith.truncf %65 : vector<8x8xf32> to vector<8x8xbf16>
    %cst_24 = arith.constant dense<0.000000e+00> : vector<8x32xf32>
    %67 = tpu.matmul %66, %46, %cst_24 {dimension_numbers = #tpu.dot_dimension_numbers<[1], [0], [0], [1], [0, 0, 1, 1], [], []>} : vector<8x8xbf16>, vector<8x32xbf16>, vector<8x32xf32> -> vector<8x32xf32>
    %68 = vector.extract_strided_slice %11 {offsets = [0, 64], sizes = [8, 32], strides = [1, 1]} : vector<16x384xf32> to vector<8x32xf32>
    %69 = arith.truncf %68 : vector<8x32xf32> to vector<8x32xbf16>
    %70 = vector.extract_strided_slice %11 {offsets = [0, 192], sizes = [8, 32], strides = [1, 1]} : vector<16x384xf32> to vector<8x32xf32>
    %71 = arith.truncf %70 : vector<8x32xf32> to vector<8x32xbf16>
    %72 = vector.extract_strided_slice %11 {offsets = [0, 320], sizes = [8, 32], strides = [1, 1]} : vector<16x384xf32> to vector<8x32xf32>
    %73 = arith.truncf %72 : vector<8x32xf32> to vector<8x32xbf16>
    %cst_25 = arith.constant dense<0.000000e+00> : vector<8x8xf32>
    %74 = tpu.matmul %69, %71, %cst_25 {dimension_numbers = #tpu.dot_dimension_numbers<[1], [1], [0], [0], [0, 0, 1, 0], [], []>} : vector<8x32xbf16>, vector<8x32xbf16>, vector<8x8xf32> -> vector<8x8xf32>
    %cst_26 = arith.constant 0.176776692 : f32
    %75 = vector.broadcast %cst_26 : f32 to vector<8x8xf32>
    %76 = arith.mulf %74, %75 : vector<8x8xf32>
    %cst_27 = arith.constant 0.000000e+00 : f32
    %77 = vector.broadcast %cst_27 : f32 to vector<1x8xf32>
    %78 = arith.cmpf ogt, %13, %77 : vector<1x8xf32>
    %cst_28 = arith.constant -3.40282347E+38 : f32
    %79 = vector.shape_cast %78 : vector<1x8xi1> to vector<1x8xi1>
    %80 = vector.broadcast %79 : vector<1x8xi1> to vector<8x8xi1>
    %81 = vector.broadcast %cst_28 : f32 to vector<8x8xf32>
    %82 = arith.select %80, %76, %81 : vector<8x8xi1>, vector<8x8xf32>
    %cst_29 = arith.constant dense<0xFF800000> : vector<8xf32>
    %83 = vector.multi_reduction <maximumf>, %82, %cst_29 [1] : vector<8x8xf32> to vector<8xf32>
    %84 = vector.shape_cast %83 : vector<8xf32> to vector<8x1xf32>
    %85 = vector.broadcast %84 : vector<8x1xf32> to vector<8x8xf32>
    %86 = arith.subf %82, %85 : vector<8x8xf32>
    %87 = math.exp %86 : vector<8x8xf32>
    %cst_30 = arith.constant dense<0.000000e+00> : vector<8xf32>
    %88 = vector.multi_reduction <add>, %87, %cst_30 [1] : vector<8x8xf32> to vector<8xf32>
    %89 = vector.shape_cast %88 : vector<8xf32> to vector<8x1xf32>
    %90 = tpu.reciprocal %89 {approx = true} : vector<8x1xf32> -> vector<8x1xf32>
    %91 = vector.broadcast %90 : vector<8x1xf32> to vector<8x8xf32>
    %92 = arith.mulf %87, %91 : vector<8x8xf32>
    %93 = arith.truncf %92 : vector<8x8xf32> to vector<8x8xbf16>
    %cst_31 = arith.constant dense<0.000000e+00> : vector<8x32xf32>
    %94 = tpu.matmul %93, %73, %cst_31 {dimension_numbers = #tpu.dot_dimension_numbers<[1], [0], [0], [1], [0, 0, 1, 1], [], []>} : vector<8x8xbf16>, vector<8x32xbf16>, vector<8x32xf32> -> vector<8x32xf32>
    %95 = vector.extract_strided_slice %11 {offsets = [0, 96], sizes = [8, 32], strides = [1, 1]} : vector<16x384xf32> to vector<8x32xf32>
    %96 = arith.truncf %95 : vector<8x32xf32> to vector<8x32xbf16>
    %97 = vector.extract_strided_slice %11 {offsets = [0, 224], sizes = [8, 32], strides = [1, 1]} : vector<16x384xf32> to vector<8x32xf32>
    %98 = arith.truncf %97 : vector<8x32xf32> to vector<8x32xbf16>
    %99 = vector.extract_strided_slice %11 {offsets = [0, 352], sizes = [8, 32], strides = [1, 1]} : vector<16x384xf32> to vector<8x32xf32>
    %100 = arith.truncf %99 : vector<8x32xf32> to vector<8x32xbf16>
    %cst_32 = arith.constant dense<0.000000e+00> : vector<8x8xf32>
    %101 = tpu.matmul %96, %98, %cst_32 {dimension_numbers = #tpu.dot_dimension_numbers<[1], [1], [0], [0], [0, 0, 1, 0], [], []>} : vector<8x32xbf16>, vector<8x32xbf16>, vector<8x8xf32> -> vector<8x8xf32>
    %cst_33 = arith.constant 0.176776692 : f32
    %102 = vector.broadcast %cst_33 : f32 to vector<8x8xf32>
    %103 = arith.mulf %101, %102 : vector<8x8xf32>
    %cst_34 = arith.constant 0.000000e+00 : f32
    %104 = vector.broadcast %cst_34 : f32 to vector<1x8xf32>
    %105 = arith.cmpf ogt, %13, %104 : vector<1x8xf32>
    %cst_35 = arith.constant -3.40282347E+38 : f32
    %106 = vector.shape_cast %105 : vector<1x8xi1> to vector<1x8xi1>
    %107 = vector.broadcast %106 : vector<1x8xi1> to vector<8x8xi1>
    %108 = vector.broadcast %cst_35 : f32 to vector<8x8xf32>
    %109 = arith.select %107, %103, %108 : vector<8x8xi1>, vector<8x8xf32>
    %cst_36 = arith.constant dense<0xFF800000> : vector<8xf32>
    %110 = vector.multi_reduction <maximumf>, %109, %cst_36 [1] : vector<8x8xf32> to vector<8xf32>
    %111 = vector.shape_cast %110 : vector<8xf32> to vector<8x1xf32>
    %112 = vector.broadcast %111 : vector<8x1xf32> to vector<8x8xf32>
    %113 = arith.subf %109, %112 : vector<8x8xf32>
    %114 = math.exp %113 : vector<8x8xf32>
    %cst_37 = arith.constant dense<0.000000e+00> : vector<8xf32>
    %115 = vector.multi_reduction <add>, %114, %cst_37 [1] : vector<8x8xf32> to vector<8xf32>
    %116 = vector.shape_cast %115 : vector<8xf32> to vector<8x1xf32>
    %117 = tpu.reciprocal %116 {approx = true} : vector<8x1xf32> -> vector<8x1xf32>
    %118 = vector.broadcast %117 : vector<8x1xf32> to vector<8x8xf32>
    %119 = arith.mulf %114, %118 : vector<8x8xf32>
    %120 = arith.truncf %119 : vector<8x8xf32> to vector<8x8xbf16>
    %cst_38 = arith.constant dense<0.000000e+00> : vector<8x32xf32>
    %121 = tpu.matmul %120, %100, %cst_38 {dimension_numbers = #tpu.dot_dimension_numbers<[1], [0], [0], [1], [0, 0, 1, 1], [], []>} : vector<8x8xbf16>, vector<8x32xbf16>, vector<8x32xf32> -> vector<8x32xf32>
    %122 = tpu.concatenate %40, %67, %94, %121 in 1 : vector<8x32xf32>, vector<8x32xf32>, vector<8x32xf32>, vector<8x32xf32> -> vector<8x128xf32>
    %c1 = arith.constant 1 : index
    %c0_39 = arith.constant 0 : index
    %c0_40 = arith.constant 0 : index
    %123 = vector.load %arg2[%c1, %c0_39, %c0_40] : memref<2x1x8xf32, #tpu.memory_space<vmem>>, vector<1x1x8xf32>
    %124 = vector.shape_cast %123 : vector<1x1x8xf32> to vector<1x8xf32>
    %125 = vector.extract_strided_slice %11 {offsets = [8, 0], sizes = [8, 32], strides = [1, 1]} : vector<16x384xf32> to vector<8x32xf32>
    %126 = arith.truncf %125 : vector<8x32xf32> to vector<8x32xbf16>
    %127 = vector.extract_strided_slice %11 {offsets = [8, 128], sizes = [8, 32], strides = [1, 1]} : vector<16x384xf32> to vector<8x32xf32>
    %128 = arith.truncf %127 : vector<8x32xf32> to vector<8x32xbf16>
    %129 = vector.extract_strided_slice %11 {offsets = [8, 256], sizes = [8, 32], strides = [1, 1]} : vector<16x384xf32> to vector<8x32xf32>
    %130 = arith.truncf %129 : vector<8x32xf32> to vector<8x32xbf16>
    %cst_41 = arith.constant dense<0.000000e+00> : vector<8x8xf32>
    %131 = tpu.matmul %126, %128, %cst_41 {dimension_numbers = #tpu.dot_dimension_numbers<[1], [1], [0], [0], [0, 0, 1, 0], [], []>} : vector<8x32xbf16>, vector<8x32xbf16>, vector<8x8xf32> -> vector<8x8xf32>
    %cst_42 = arith.constant 0.176776692 : f32
    %132 = vector.broadcast %cst_42 : f32 to vector<8x8xf32>
    %133 = arith.mulf %131, %132 : vector<8x8xf32>
    %cst_43 = arith.constant 0.000000e+00 : f32
    %134 = vector.broadcast %cst_43 : f32 to vector<1x8xf32>
    %135 = arith.cmpf ogt, %124, %134 : vector<1x8xf32>
    %cst_44 = arith.constant -3.40282347E+38 : f32
    %136 = vector.shape_cast %135 : vector<1x8xi1> to vector<1x8xi1>
    %137 = vector.broadcast %136 : vector<1x8xi1> to vector<8x8xi1>
    %138 = vector.broadcast %cst_44 : f32 to vector<8x8xf32>
    %139 = arith.select %137, %133, %138 : vector<8x8xi1>, vector<8x8xf32>
    %cst_45 = arith.constant dense<0xFF800000> : vector<8xf32>
    %140 = vector.multi_reduction <maximumf>, %139, %cst_45 [1] : vector<8x8xf32> to vector<8xf32>
    %141 = vector.shape_cast %140 : vector<8xf32> to vector<8x1xf32>
    %142 = vector.broadcast %141 : vector<8x1xf32> to vector<8x8xf32>
    %143 = arith.subf %139, %142 : vector<8x8xf32>
    %144 = math.exp %143 : vector<8x8xf32>
    %cst_46 = arith.constant dense<0.000000e+00> : vector<8xf32>
    %145 = vector.multi_reduction <add>, %144, %cst_46 [1] : vector<8x8xf32> to vector<8xf32>
    %146 = vector.shape_cast %145 : vector<8xf32> to vector<8x1xf32>
    %147 = tpu.reciprocal %146 {approx = true} : vector<8x1xf32> -> vector<8x1xf32>
    %148 = vector.broadcast %147 : vector<8x1xf32> to vector<8x8xf32>
    %149 = arith.mulf %144, %148 : vector<8x8xf32>
    %150 = arith.truncf %149 : vector<8x8xf32> to vector<8x8xbf16>
    %cst_47 = arith.constant dense<0.000000e+00> : vector<8x32xf32>
    %151 = tpu.matmul %150, %130, %cst_47 {dimension_numbers = #tpu.dot_dimension_numbers<[1], [0], [0], [1], [0, 0, 1, 1], [], []>} : vector<8x8xbf16>, vector<8x32xbf16>, vector<8x32xf32> -> vector<8x32xf32>
    %152 = vector.extract_strided_slice %11 {offsets = [8, 32], sizes = [8, 32], strides = [1, 1]} : vector<16x384xf32> to vector<8x32xf32>
    %153 = arith.truncf %152 : vector<8x32xf32> to vector<8x32xbf16>
    %154 = vector.extract_strided_slice %11 {offsets = [8, 160], sizes = [8, 32], strides = [1, 1]} : vector<16x384xf32> to vector<8x32xf32>
    %155 = arith.truncf %154 : vector<8x32xf32> to vector<8x32xbf16>
    %156 = vector.extract_strided_slice %11 {offsets = [8, 288], sizes = [8, 32], strides = [1, 1]} : vector<16x384xf32> to vector<8x32xf32>
    %157 = arith.truncf %156 : vector<8x32xf32> to vector<8x32xbf16>
    %cst_48 = arith.constant dense<0.000000e+00> : vector<8x8xf32>
    %158 = tpu.matmul %153, %155, %cst_48 {dimension_numbers = #tpu.dot_dimension_numbers<[1], [1], [0], [0], [0, 0, 1, 0], [], []>} : vector<8x32xbf16>, vector<8x32xbf16>, vector<8x8xf32> -> vector<8x8xf32>
    %cst_49 = arith.constant 0.176776692 : f32
    %159 = vector.broadcast %cst_49 : f32 to vector<8x8xf32>
    %160 = arith.mulf %158, %159 : vector<8x8xf32>
    %cst_50 = arith.constant 0.000000e+00 : f32
    %161 = vector.broadcast %cst_50 : f32 to vector<1x8xf32>
    %162 = arith.cmpf ogt, %124, %161 : vector<1x8xf32>
    %cst_51 = arith.constant -3.40282347E+38 : f32
    %163 = vector.shape_cast %162 : vector<1x8xi1> to vector<1x8xi1>
    %164 = vector.broadcast %163 : vector<1x8xi1> to vector<8x8xi1>
    %165 = vector.broadcast %cst_51 : f32 to vector<8x8xf32>
    %166 = arith.select %164, %160, %165 : vector<8x8xi1>, vector<8x8xf32>
    %cst_52 = arith.constant dense<0xFF800000> : vector<8xf32>
    %167 = vector.multi_reduction <maximumf>, %166, %cst_52 [1] : vector<8x8xf32> to vector<8xf32>
    %168 = vector.shape_cast %167 : vector<8xf32> to vector<8x1xf32>
    %169 = vector.broadcast %168 : vector<8x1xf32> to vector<8x8xf32>
    %170 = arith.subf %166, %169 : vector<8x8xf32>
    %171 = math.exp %170 : vector<8x8xf32>
    %cst_53 = arith.constant dense<0.000000e+00> : vector<8xf32>
    %172 = vector.multi_reduction <add>, %171, %cst_53 [1] : vector<8x8xf32> to vector<8xf32>
    %173 = vector.shape_cast %172 : vector<8xf32> to vector<8x1xf32>
    %174 = tpu.reciprocal %173 {approx = true} : vector<8x1xf32> -> vector<8x1xf32>
    %175 = vector.broadcast %174 : vector<8x1xf32> to vector<8x8xf32>
    %176 = arith.mulf %171, %175 : vector<8x8xf32>
    %177 = arith.truncf %176 : vector<8x8xf32> to vector<8x8xbf16>
    %cst_54 = arith.constant dense<0.000000e+00> : vector<8x32xf32>
    %178 = tpu.matmul %177, %157, %cst_54 {dimension_numbers = #tpu.dot_dimension_numbers<[1], [0], [0], [1], [0, 0, 1, 1], [], []>} : vector<8x8xbf16>, vector<8x32xbf16>, vector<8x32xf32> -> vector<8x32xf32>
    %179 = vector.extract_strided_slice %11 {offsets = [8, 64], sizes = [8, 32], strides = [1, 1]} : vector<16x384xf32> to vector<8x32xf32>
    %180 = arith.truncf %179 : vector<8x32xf32> to vector<8x32xbf16>
    %181 = vector.extract_strided_slice %11 {offsets = [8, 192], sizes = [8, 32], strides = [1, 1]} : vector<16x384xf32> to vector<8x32xf32>
    %182 = arith.truncf %181 : vector<8x32xf32> to vector<8x32xbf16>
    %183 = vector.extract_strided_slice %11 {offsets = [8, 320], sizes = [8, 32], strides = [1, 1]} : vector<16x384xf32> to vector<8x32xf32>
    %184 = arith.truncf %183 : vector<8x32xf32> to vector<8x32xbf16>
    %cst_55 = arith.constant dense<0.000000e+00> : vector<8x8xf32>
    %185 = tpu.matmul %180, %182, %cst_55 {dimension_numbers = #tpu.dot_dimension_numbers<[1], [1], [0], [0], [0, 0, 1, 0], [], []>} : vector<8x32xbf16>, vector<8x32xbf16>, vector<8x8xf32> -> vector<8x8xf32>
    %cst_56 = arith.constant 0.176776692 : f32
    %186 = vector.broadcast %cst_56 : f32 to vector<8x8xf32>
    %187 = arith.mulf %185, %186 : vector<8x8xf32>
    %cst_57 = arith.constant 0.000000e+00 : f32
    %188 = vector.broadcast %cst_57 : f32 to vector<1x8xf32>
    %189 = arith.cmpf ogt, %124, %188 : vector<1x8xf32>
    %cst_58 = arith.constant -3.40282347E+38 : f32
    %190 = vector.shape_cast %189 : vector<1x8xi1> to vector<1x8xi1>
    %191 = vector.broadcast %190 : vector<1x8xi1> to vector<8x8xi1>
    %192 = vector.broadcast %cst_58 : f32 to vector<8x8xf32>
    %193 = arith.select %191, %187, %192 : vector<8x8xi1>, vector<8x8xf32>
    %cst_59 = arith.constant dense<0xFF800000> : vector<8xf32>
    %194 = vector.multi_reduction <maximumf>, %193, %cst_59 [1] : vector<8x8xf32> to vector<8xf32>
    %195 = vector.shape_cast %194 : vector<8xf32> to vector<8x1xf32>
    %196 = vector.broadcast %195 : vector<8x1xf32> to vector<8x8xf32>
    %197 = arith.subf %193, %196 : vector<8x8xf32>
    %198 = math.exp %197 : vector<8x8xf32>
    %cst_60 = arith.constant dense<0.000000e+00> : vector<8xf32>
    %199 = vector.multi_reduction <add>, %198, %cst_60 [1] : vector<8x8xf32> to vector<8xf32>
    %200 = vector.shape_cast %199 : vector<8xf32> to vector<8x1xf32>
    %201 = tpu.reciprocal %200 {approx = true} : vector<8x1xf32> -> vector<8x1xf32>
    %202 = vector.broadcast %201 : vector<8x1xf32> to vector<8x8xf32>
    %203 = arith.mulf %198, %202 : vector<8x8xf32>
    %204 = arith.truncf %203 : vector<8x8xf32> to vector<8x8xbf16>
    %cst_61 = arith.constant dense<0.000000e+00> : vector<8x32xf32>
    %205 = tpu.matmul %204, %184, %cst_61 {dimension_numbers = #tpu.dot_dimension_numbers<[1], [0], [0], [1], [0, 0, 1, 1], [], []>} : vector<8x8xbf16>, vector<8x32xbf16>, vector<8x32xf32> -> vector<8x32xf32>
    %206 = vector.extract_strided_slice %11 {offsets = [8, 96], sizes = [8, 32], strides = [1, 1]} : vector<16x384xf32> to vector<8x32xf32>
    %207 = arith.truncf %206 : vector<8x32xf32> to vector<8x32xbf16>
    %208 = vector.extract_strided_slice %11 {offsets = [8, 224], sizes = [8, 32], strides = [1, 1]} : vector<16x384xf32> to vector<8x32xf32>
    %209 = arith.truncf %208 : vector<8x32xf32> to vector<8x32xbf16>
    %210 = vector.extract_strided_slice %11 {offsets = [8, 352], sizes = [8, 32], strides = [1, 1]} : vector<16x384xf32> to vector<8x32xf32>
    %211 = arith.truncf %210 : vector<8x32xf32> to vector<8x32xbf16>
    %cst_62 = arith.constant dense<0.000000e+00> : vector<8x8xf32>
    %212 = tpu.matmul %207, %209, %cst_62 {dimension_numbers = #tpu.dot_dimension_numbers<[1], [1], [0], [0], [0, 0, 1, 0], [], []>} : vector<8x32xbf16>, vector<8x32xbf16>, vector<8x8xf32> -> vector<8x8xf32>
    %cst_63 = arith.constant 0.176776692 : f32
    %213 = vector.broadcast %cst_63 : f32 to vector<8x8xf32>
    %214 = arith.mulf %212, %213 : vector<8x8xf32>
    %cst_64 = arith.constant 0.000000e+00 : f32
    %215 = vector.broadcast %cst_64 : f32 to vector<1x8xf32>
    %216 = arith.cmpf ogt, %124, %215 : vector<1x8xf32>
    %cst_65 = arith.constant -3.40282347E+38 : f32
    %217 = vector.shape_cast %216 : vector<1x8xi1> to vector<1x8xi1>
    %218 = vector.broadcast %217 : vector<1x8xi1> to vector<8x8xi1>
    %219 = vector.broadcast %cst_65 : f32 to vector<8x8xf32>
    %220 = arith.select %218, %214, %219 : vector<8x8xi1>, vector<8x8xf32>
    %cst_66 = arith.constant dense<0xFF800000> : vector<8xf32>
    %221 = vector.multi_reduction <maximumf>, %220, %cst_66 [1] : vector<8x8xf32> to vector<8xf32>
    %222 = vector.shape_cast %221 : vector<8xf32> to vector<8x1xf32>
    %223 = vector.broadcast %222 : vector<8x1xf32> to vector<8x8xf32>
    %224 = arith.subf %220, %223 : vector<8x8xf32>
    %225 = math.exp %224 : vector<8x8xf32>
    %cst_67 = arith.constant dense<0.000000e+00> : vector<8xf32>
    %226 = vector.multi_reduction <add>, %225, %cst_67 [1] : vector<8x8xf32> to vector<8xf32>
    %227 = vector.shape_cast %226 : vector<8xf32> to vector<8x1xf32>
    %228 = tpu.reciprocal %227 {approx = true} : vector<8x1xf32> -> vector<8x1xf32>
    %229 = vector.broadcast %228 : vector<8x1xf32> to vector<8x8xf32>
    %230 = arith.mulf %225, %229 : vector<8x8xf32>
    %231 = arith.truncf %230 : vector<8x8xf32> to vector<8x8xbf16>
    %cst_68 = arith.constant dense<0.000000e+00> : vector<8x32xf32>
    %232 = tpu.matmul %231, %211, %cst_68 {dimension_numbers = #tpu.dot_dimension_numbers<[1], [0], [0], [1], [0, 0, 1, 1], [], []>} : vector<8x8xbf16>, vector<8x32xbf16>, vector<8x32xf32> -> vector<8x32xf32>
    %233 = tpu.concatenate %151, %178, %205, %232 in 1 : vector<8x32xf32>, vector<8x32xf32>, vector<8x32xf32>, vector<8x32xf32> -> vector<8x128xf32>
    %234 = tpu.concatenate %122, %233 in 0 : vector<8x128xf32>, vector<8x128xf32> -> vector<16x128xf32>
    %235 = arith.truncf %234 : vector<16x128xf32> to vector<16x128xbf16>
    %c0_69 = arith.constant 0 : index
    %c0_70 = arith.constant 0 : index
    %c0_71 = arith.constant 0 : index
    %236 = vector.load %arg7[%c0_69, %c0_70, %c0_71] : memref<1x128x128xbf16, #tpu.memory_space<vmem>>, vector<1x128x128xbf16>
    %237 = vector.shape_cast %236 : vector<1x128x128xbf16> to vector<128x128xbf16>
    %cst_72 = arith.constant dense<0.000000e+00> : vector<16x128xf32>
    %238 = tpu.matmul %235, %237, %cst_72 {dimension_numbers = #tpu.dot_dimension_numbers<[1], [0], [0], [1], [0, 0, 1, 1], [], []>} : vector<16x128xbf16>, vector<128x128xbf16>, vector<16x128xf32> -> vector<16x128xf32>
    %c0_73 = arith.constant 0 : index
    %c0_74 = arith.constant 0 : index
    %c0_75 = arith.constant 0 : index
    %239 = vector.load %arg8[%c0_73, %c0_74, %c0_75] : memref<1x1x128xf32, #tpu.memory_space<vmem>>, vector<1x1x128xf32>
    %240 = vector.shape_cast %239 : vector<1x1x128xf32> to vector<1x128xf32>
    %241 = vector.broadcast %240 : vector<1x128xf32> to vector<16x128xf32>
    %242 = arith.addf %238, %241 : vector<16x128xf32>
    %243 = arith.addf %242, %3 : vector<16x128xf32>
    %c0_76 = arith.constant 0 : index
    %c0_77 = arith.constant 0 : index
    %c0_78 = arith.constant 0 : index
    %244 = vector.load %arg9[%c0_76, %c0_77, %c0_78] : memref<1x1x128xf32, #tpu.memory_space<vmem>>, vector<1x1x128xf32>
    %245 = vector.shape_cast %244 : vector<1x1x128xf32> to vector<1x128xf32>
    %c0_79 = arith.constant 0 : index
    %c0_80 = arith.constant 0 : index
    %c0_81 = arith.constant 0 : index
    %246 = vector.load %arg10[%c0_79, %c0_80, %c0_81] : memref<1x1x128xf32, #tpu.memory_space<vmem>>, vector<1x1x128xf32>
    %247 = vector.shape_cast %246 : vector<1x1x128xf32> to vector<1x128xf32>
    %cst_82 = arith.constant dense<0.000000e+00> : vector<16xf32>
    %248 = vector.multi_reduction <add>, %243, %cst_82 [1] : vector<16x128xf32> to vector<16xf32>
    %249 = vector.shape_cast %248 : vector<16xf32> to vector<16x1xf32>
    %cst_83 = arith.constant 1.280000e+02 : f32
    %250 = vector.broadcast %cst_83 : f32 to vector<16x1xf32>
    %251 = arith.divf %249, %250 : vector<16x1xf32>
    %252 = vector.broadcast %251 : vector<16x1xf32> to vector<16x128xf32>
    %253 = arith.subf %243, %252 : vector<16x128xf32>
    %254 = arith.mulf %253, %253 : vector<16x128xf32>
    %cst_84 = arith.constant dense<0.000000e+00> : vector<16xf32>
    %255 = vector.multi_reduction <add>, %254, %cst_84 [1] : vector<16x128xf32> to vector<16xf32>
    %256 = vector.shape_cast %255 : vector<16xf32> to vector<16x1xf32>
    %cst_85 = arith.constant 1.280000e+02 : f32
    %257 = vector.broadcast %cst_85 : f32 to vector<16x1xf32>
    %258 = arith.divf %256, %257 : vector<16x1xf32>
    %cst_86 = arith.constant 9.99999996E-13 : f32
    %259 = vector.broadcast %cst_86 : f32 to vector<16x1xf32>
    %260 = arith.addf %258, %259 : vector<16x1xf32>
    %261 = math.rsqrt %260 : vector<16x1xf32>
    %262 = vector.broadcast %251 : vector<16x1xf32> to vector<16x128xf32>
    %263 = arith.subf %243, %262 : vector<16x128xf32>
    %264 = vector.broadcast %261 : vector<16x1xf32> to vector<16x128xf32>
    %265 = arith.mulf %263, %264 : vector<16x128xf32>
    %266 = vector.broadcast %245 : vector<1x128xf32> to vector<16x128xf32>
    %267 = arith.mulf %265, %266 : vector<16x128xf32>
    %268 = vector.broadcast %247 : vector<1x128xf32> to vector<16x128xf32>
    %269 = arith.addf %267, %268 : vector<16x128xf32>
    %270 = arith.truncf %269 : vector<16x128xf32> to vector<16x128xbf16>
    %c0_87 = arith.constant 0 : index
    %c0_88 = arith.constant 0 : index
    %c0_89 = arith.constant 0 : index
    %271 = vector.load %arg11[%c0_87, %c0_88, %c0_89] : memref<1x128x256xbf16, #tpu.memory_space<vmem>>, vector<1x128x256xbf16>
    %272 = vector.shape_cast %271 : vector<1x128x256xbf16> to vector<128x256xbf16>
    %cst_90 = arith.constant dense<0.000000e+00> : vector<16x256xf32>
    %273 = tpu.matmul %270, %272, %cst_90 {dimension_numbers = #tpu.dot_dimension_numbers<[1], [0], [0], [1], [0, 0, 1, 1], [], []>} : vector<16x128xbf16>, vector<128x256xbf16>, vector<16x256xf32> -> vector<16x256xf32>
    %c0_91 = arith.constant 0 : index
    %c0_92 = arith.constant 0 : index
    %c0_93 = arith.constant 0 : index
    %274 = vector.load %arg12[%c0_91, %c0_92, %c0_93] : memref<1x1x256xf32, #tpu.memory_space<vmem>>, vector<1x1x256xf32>
    %275 = vector.shape_cast %274 : vector<1x1x256xf32> to vector<1x256xf32>
    %276 = vector.broadcast %275 : vector<1x256xf32> to vector<16x256xf32>
    %277 = arith.addf %273, %276 : vector<16x256xf32>
    %cst_94 = arith.constant 5.000000e-01 : f32
    %278 = vector.broadcast %cst_94 : f32 to vector<16x256xf32>
    %279 = arith.mulf %278, %277 : vector<16x256xf32>
    %cst_95 = arith.constant 4.471500e-02 : f32
    %280 = vector.broadcast %cst_95 : f32 to vector<16x256xf32>
    %281 = arith.mulf %280, %277 : vector<16x256xf32>
    %282 = arith.mulf %281, %277 : vector<16x256xf32>
    %283 = arith.mulf %282, %277 : vector<16x256xf32>
    %284 = arith.addf %277, %283 : vector<16x256xf32>
    %cst_96 = arith.constant 0.797884583 : f32
    %285 = vector.broadcast %cst_96 : f32 to vector<16x256xf32>
    %286 = arith.mulf %285, %284 : vector<16x256xf32>
    %287 = math.tanh %286 : vector<16x256xf32>
    %cst_97 = arith.constant 1.000000e+00 : f32
    %288 = vector.broadcast %cst_97 : f32 to vector<16x256xf32>
    %289 = arith.addf %288, %287 : vector<16x256xf32>
    %290 = arith.mulf %279, %289 : vector<16x256xf32>
    %291 = arith.truncf %290 : vector<16x256xf32> to vector<16x256xbf16>
    %c0_98 = arith.constant 0 : index
    %c0_99 = arith.constant 0 : index
    %c0_100 = arith.constant 0 : index
    %292 = vector.load %arg13[%c0_98, %c0_99, %c0_100] : memref<1x256x128xbf16, #tpu.memory_space<vmem>>, vector<1x256x128xbf16>
    %293 = vector.shape_cast %292 : vector<1x256x128xbf16> to vector<256x128xbf16>
    %cst_101 = arith.constant dense<0.000000e+00> : vector<16x128xf32>
    %294 = tpu.matmul %291, %293, %cst_101 {dimension_numbers = #tpu.dot_dimension_numbers<[1], [0], [0], [1], [0, 0, 1, 1], [], []>} : vector<16x256xbf16>, vector<256x128xbf16>, vector<16x128xf32> -> vector<16x128xf32>
    %c0_102 = arith.constant 0 : index
    %c0_103 = arith.constant 0 : index
    %c0_104 = arith.constant 0 : index
    %295 = vector.load %arg14[%c0_102, %c0_103, %c0_104] : memref<1x1x128xf32, #tpu.memory_space<vmem>>, vector<1x1x128xf32>
    %296 = vector.shape_cast %295 : vector<1x1x128xf32> to vector<1x128xf32>
    %297 = vector.broadcast %296 : vector<1x128xf32> to vector<16x128xf32>
    %298 = arith.addf %294, %297 : vector<16x128xf32>
    %299 = arith.addf %298, %269 : vector<16x128xf32>
    %c0_105 = arith.constant 0 : index
    %c0_106 = arith.constant 0 : index
    %c0_107 = arith.constant 0 : index
    %300 = vector.load %arg15[%c0_105, %c0_106, %c0_107] : memref<1x1x128xf32, #tpu.memory_space<vmem>>, vector<1x1x128xf32>
    %301 = vector.shape_cast %300 : vector<1x1x128xf32> to vector<1x128xf32>
    %c0_108 = arith.constant 0 : index
    %c0_109 = arith.constant 0 : index
    %c0_110 = arith.constant 0 : index
    %302 = vector.load %arg16[%c0_108, %c0_109, %c0_110] : memref<1x1x128xf32, #tpu.memory_space<vmem>>, vector<1x1x128xf32>
    %303 = vector.shape_cast %302 : vector<1x1x128xf32> to vector<1x128xf32>
    %cst_111 = arith.constant dense<0.000000e+00> : vector<16xf32>
    %304 = vector.multi_reduction <add>, %299, %cst_111 [1] : vector<16x128xf32> to vector<16xf32>
    %305 = vector.shape_cast %304 : vector<16xf32> to vector<16x1xf32>
    %cst_112 = arith.constant 1.280000e+02 : f32
    %306 = vector.broadcast %cst_112 : f32 to vector<16x1xf32>
    %307 = arith.divf %305, %306 : vector<16x1xf32>
    %308 = vector.broadcast %307 : vector<16x1xf32> to vector<16x128xf32>
    %309 = arith.subf %299, %308 : vector<16x128xf32>
    %310 = arith.mulf %309, %309 : vector<16x128xf32>
    %cst_113 = arith.constant dense<0.000000e+00> : vector<16xf32>
    %311 = vector.multi_reduction <add>, %310, %cst_113 [1] : vector<16x128xf32> to vector<16xf32>
    %312 = vector.shape_cast %311 : vector<16xf32> to vector<16x1xf32>
    %cst_114 = arith.constant 1.280000e+02 : f32
    %313 = vector.broadcast %cst_114 : f32 to vector<16x1xf32>
    %314 = arith.divf %312, %313 : vector<16x1xf32>
    %cst_115 = arith.constant 9.99999996E-13 : f32
    %315 = vector.broadcast %cst_115 : f32 to vector<16x1xf32>
    %316 = arith.addf %314, %315 : vector<16x1xf32>
    %317 = math.rsqrt %316 : vector<16x1xf32>
    %318 = vector.broadcast %307 : vector<16x1xf32> to vector<16x128xf32>
    %319 = arith.subf %299, %318 : vector<16x128xf32>
    %320 = vector.broadcast %317 : vector<16x1xf32> to vector<16x128xf32>
    %321 = arith.mulf %319, %320 : vector<16x128xf32>
    %322 = vector.broadcast %301 : vector<1x128xf32> to vector<16x128xf32>
    %323 = arith.mulf %321, %322 : vector<16x128xf32>
    %324 = vector.broadcast %303 : vector<1x128xf32> to vector<16x128xf32>
    %325 = arith.addf %323, %324 : vector<16x128xf32>
    %c0_116 = arith.constant 0 : index
    %c0_117 = arith.constant 0 : index
    %326 = vector.load %arg20[%c0_116, %c0_117] : memref<16x128xf32, #tpu.memory_space<vmem>>, vector<16x128xf32>
    tpu.vector_store %arg20[%c0_116, %c0_117], %325 {strides = array<i32>} : memref<16x128xf32, #tpu.memory_space<vmem>>, vector<16x128xf32>,
    %c1_i32 = arith.constant 1 : i32
    %327 = arith.cmpi eq, %arg0, %c1_i32 : i32
    %328 = arith.extui %327 : i1 to i32
    %c0_i32_118 = arith.constant 0 : i32
    %329 = arith.cmpi ne, %328, %c0_i32_118 : i32
    scf.if %329 {
      %330 = vector.extract_strided_slice %325 {offsets = [0, 0], sizes = [1, 128], strides = [1, 1]} : vector<16x128xf32> to vector<1x128xf32>
      %331 = vector.extract_strided_slice %325 {offsets = [8, 0], sizes = [1, 128], strides = [1, 1]} : vector<16x128xf32> to vector<1x128xf32>
      %332 = tpu.concatenate %330, %331 in 0 : vector<1x128xf32>, vector<1x128xf32> -> vector<2x128xf32>
      %333 = arith.truncf %332 : vector<2x128xf32> to vector<2x128xbf16>
      %c0_119 = arith.constant 0 : index
      %c0_120 = arith.constant 0 : index
      %334 = vector.load %arg17[%c0_119, %c0_120] : memref<128x128xbf16, #tpu.memory_space<vmem>>, vector<128x128xbf16>
      %cst_121 = arith.constant dense<0.000000e+00> : vector<2x128xf32>
      %335 = tpu.matmul %333, %334, %cst_121 {dimension_numbers = #tpu.dot_dimension_numbers<[1], [0], [0], [1], [0, 0, 1, 1], [], []>} : vector<2x128xbf16>, vector<128x128xbf16>, vector<2x128xf32> -> vector<2x128xf32>
      %c0_122 = arith.constant 0 : index
      %c0_123 = arith.constant 0 : index
      %336 = vector.load %arg18[%c0_122, %c0_123] : memref<1x128xf32, #tpu.memory_space<vmem>>, vector<1x128xf32>
      %337 = vector.broadcast %336 : vector<1x128xf32> to vector<2x128xf32>
      %338 = arith.addf %335, %337 : vector<2x128xf32>
      %c0_124 = arith.constant 0 : index
      %c0_125 = arith.constant 0 : index
      %339 = vector.load %arg19[%c0_124, %c0_125] : memref<2x128xf32, #tpu.memory_space<vmem>>, vector<2x128xf32>
      tpu.vector_store %arg19[%c0_124, %c0_125], %338 {strides = array<i32>} : memref<2x128xf32, #tpu.memory_space<vmem>>, vector<2x128xf32>,
    } else {
    }
    return
  }
  func.func @transform_0(%arg0: i32) -> (i32, i32) {
    %c0_i32 = arith.constant 0 : i32
    %c0_i32_0 = arith.constant 0 : i32
    %c0_i32_1 = arith.constant 0 : i32
    return %c0_i32, %c0_i32_0 : i32, i32
  }
  func.func @transform_1(%arg0: i32) -> (i32, i32, i32) {
    %c0_i32 = arith.constant 0 : i32
    %c0_i32_0 = arith.constant 0 : i32
    %c0_i32_1 = arith.constant 0 : i32
    %c0_i32_2 = arith.constant 0 : i32
    return %c0_i32, %c0_i32_0, %c0_i32_1 : i32, i32, i32
  }
  func.func @transform_2(%arg0: i32) -> (i32, i32) {
    %c0_i32 = arith.constant 0 : i32
    %c0_i32_0 = arith.constant 0 : i32
    %c0_i32_1 = arith.constant 0 : i32
    return %c0_i32, %c0_i32_0 : i32, i32
  }
  func.func @transform_3(%arg0: i32) -> (i32, i32) {
    %c0_i32 = arith.constant 0 : i32
    %c0_i32_0 = arith.constant 0 : i32
    %c0_i32_1 = arith.constant 0 : i32
    return %c0_i32, %c0_i32_0 : i32, i32
  }
  func.func @transform_4(%arg0: i32) -> (i32, i32, i32) {
    %c0_i32 = arith.constant 0 : i32
    %c0_i32_0 = arith.constant 0 : i32
    %c0_i32_1 = arith.constant 0 : i32
    return %arg0, %c0_i32, %c0_i32_0 : i32, i32, i32
  }
  func.func @transform_5(%arg0: i32) -> (i32, i32, i32) {
    %c0_i32 = arith.constant 0 : i32
    %c0_i32_0 = arith.constant 0 : i32
    %c0_i32_1 = arith.constant 0 : i32
    return %arg0, %c0_i32, %c0_i32_0 : i32, i32, i32
  }
  func.func @transform_6(%arg0: i32) -> (i32, i32, i32) {
    %c0_i32 = arith.constant 0 : i32
    %c0_i32_0 = arith.constant 0 : i32
    %c0_i32_1 = arith.constant 0 : i32
    return %arg0, %c0_i32, %c0_i32_0 : i32, i32, i32
  }
  func.func @transform_7(%arg0: i32) -> (i32, i32, i32) {
    %c0_i32 = arith.constant 0 : i32
    %c0_i32_0 = arith.constant 0 : i32
    %c0_i32_1 = arith.constant 0 : i32
    return %arg0, %c0_i32, %c0_i32_0 : i32, i32, i32
  }
  func.func @transform_8(%arg0: i32) -> (i32, i32, i32) {
    %c0_i32 = arith.constant 0 : i32
    %c0_i32_0 = arith.constant 0 : i32
    %c0_i32_1 = arith.constant 0 : i32
    return %arg0, %c0_i32, %c0_i32_0 : i32, i32, i32
  }
  func.func @transform_9(%arg0: i32) -> (i32, i32, i32) {
    %c0_i32 = arith.constant 0 : i32
    %c0_i32_0 = arith.constant 0 : i32
    %c0_i32_1 = arith.constant 0 : i32
    return %arg0, %c0_i32, %c0_i32_0 : i32, i32, i32
  }
  func.func @transform_10(%arg0: i32) -> (i32, i32, i32) {
    %c0_i32 = arith.constant 0 : i32
    %c0_i32_0 = arith.constant 0 : i32
    %c0_i32_1 = arith.constant 0 : i32
    return %arg0, %c0_i32, %c0_i32_0 : i32, i32, i32
  }
  func.func @transform_11(%arg0: i32) -> (i32, i32, i32) {
    %c0_i32 = arith.constant 0 : i32
    %c0_i32_0 = arith.constant 0 : i32
    %c0_i32_1 = arith.constant 0 : i32
    return %arg0, %c0_i32, %c0_i32_0 : i32, i32, i32
  }
  func.func @transform_12(%arg0: i32) -> (i32, i32, i32) {
    %c0_i32 = arith.constant 0 : i32
    %c0_i32_0 = arith.constant 0 : i32
    %c0_i32_1 = arith.constant 0 : i32
    return %arg0, %c0_i32, %c0_i32_0 : i32, i32, i32
  }
  func.func @transform_13(%arg0: i32) -> (i32, i32, i32) {
    %c0_i32 = arith.constant 0 : i32
    %c0_i32_0 = arith.constant 0 : i32
    %c0_i32_1 = arith.constant 0 : i32
    return %arg0, %c0_i32, %c0_i32_0 : i32, i32, i32
  }
  func.func @transform_14(%arg0: i32) -> (i32, i32, i32) {
    %c0_i32 = arith.constant 0 : i32
    %c0_i32_0 = arith.constant 0 : i32
    %c0_i32_1 = arith.constant 0 : i32
    return %arg0, %c0_i32, %c0_i32_0 : i32, i32, i32
  }
  func.func @transform_15(%arg0: i32) -> (i32, i32, i32) {
    %c0_i32 = arith.constant 0 : i32
    %c0_i32_0 = arith.constant 0 : i32
    %c0_i32_1 = arith.constant 0 : i32
    return %arg0, %c0_i32, %c0_i32_0 : i32, i32, i32
  }
  func.func @transform_16(%arg0: i32) -> (i32, i32) {
    %c0_i32 = arith.constant 0 : i32
    %c0_i32_0 = arith.constant 0 : i32
    %c0_i32_1 = arith.constant 0 : i32
    return %c0_i32, %c0_i32_0 : i32, i32
  }
  func.func @transform_17(%arg0: i32) -> (i32, i32) {
    %c0_i32 = arith.constant 0 : i32
    %c0_i32_0 = arith.constant 0 : i32
    %c0_i32_1 = arith.constant 0 : i32
    return %c0_i32, %c0_i32_0 : i32, i32
  }
  func.func @transform_18(%arg0: i32) -> (i32, i32) {
    %c0_i32 = arith.constant 0 : i32
    %c0_i32_0 = arith.constant 0 : i32
    %c0_i32_1 = arith.constant 0 : i32
    return %c0_i32, %c0_i32_0 : i32, i32
  }
}

</mosaic_0001>

<bundles_post_ra>
// kernel: tpu_custom_call.1
= control target key start
LH: loop header
LB: loop body
LE: loop exit
PB: predicated region body
PF: predicated region fallthrough
CT: control target
= control target key end

     0   :  { %s4373_s0 = inlined_call_operand.hbm [shape: f32[16,128], index: 0, kind: input, shape index: {}]   ;;  %s4374_s1 = inlined_call_operand.hbm [shape: f32[2,1,8], index: 1, kind: input, shape index: {}]   ;;  %s4375_s2 = inlined_call_operand.hbm [shape: f32[1,128], index: 2, kind: input, shape index: {}]   ;;  %s4376_s3 = inlined_call_operand.hbm [shape: f32[1,128], index: 3, kind: input, shape index: {}]   ;;  %s4377_s4 = inlined_call_operand.hbm [shape: bf16[2,128,384], index: 4, kind: input, shape index: {}]   ;;  %s4378_s5 = inlined_call_operand.hbm [shape: f32[2,1,384], index: 5, kind: input, shape index: {}]   ;;  %s4379_s6 = inlined_call_operand.hbm [shape: bf16[2,128,128], index: 6, kind: input, shape index: {}]   ;;  %s4380_s7 = inlined_call_operand.vmem [shape: f32[2,1,128], index: 7, kind: input, shape index: {}]   ;;  %s4381_s8 = inlined_call_operand.hbm [shape: f32[2,1,128], index: 8, kind: input, shape index: {}]   ;;  %s4382_s9 = inlined_call_operand.vmem [shape: f32[2,1,128], index: 9, kind: input, shape index: {}]   ;;  %s4383_s10 = inlined_call_operand.hbm [shape: bf16[2,128,256], index: 10, kind: input, shape index: {}]   ;;  %s4384_s11 = inlined_call_operand.vmem [shape: f32[2,1,256], index: 11, kind: input, shape index: {}]   ;;  %s4385_s12 = inlined_call_operand.hbm [shape: bf16[2,256,128], index: 12, kind: input, shape index: {}]   ;;  %s4386_s13 = inlined_call_operand.vmem [shape: f32[2,1,128], index: 13, kind: input, shape index: {}]   ;;  %s4387_s14 = inlined_call_operand.vmem [shape: f32[2,1,128], index: 14, kind: input, shape index: {}]   ;;  %s4388_s15 = inlined_call_operand.vmem [shape: f32[2,1,128], index: 15, kind: input, shape index: {}]   ;;  %s4389_s16 = inlined_call_operand.hbm [shape: bf16[128,128], index: 16, kind: input, shape index: {}]   ;;  %s4390_s17 = inlined_call_operand.vmem [shape: f32[1,128], index: 17, kind: input, shape index: {}]   ;;  %s4391_s18 = inlined_call_operand.hbm [shape: f32[2,128], index: 18, kind: output, shape index: {}]  }
   0x1   :  { %4403 = sst [smem:[#allocation30_spill]] %s4373_s0 }
   0x2   :  { %4404 = sst [smem:[#allocation31_spill]] %s4374_s1 }
   0x3   :  { %4405 = sst [smem:[#allocation32_spill]] %s4375_s2 }
   0x4   :  { %4406 = sst [smem:[#allocation33_spill]] %s4376_s3 }
   0x5   :  { %4407 = sst [smem:[#allocation34_spill]] %s4377_s4 }
   0x6   :  { %4408 = sst [smem:[#allocation35_spill]] %s4378_s5 }
   0x7   :  { %4409 = sst [smem:[#allocation36_spill]] %s4379_s6 }
   0x8   :  { %4410 = sst [smem:[#allocation37_spill]] %s4380_s7 }
   0x9   :  { %4411 = sst [smem:[#allocation38_spill]] %s4381_s8 }
   0xa   :  { %4412 = sst [smem:[#allocation39_spill]] %s4382_s9 }
   0xb   :  { %4413 = sst [smem:[#allocation40_spill]] %s4383_s10 }
   0xc   :  { %4414 = sst [smem:[#allocation41_spill]] %s4384_s11 }
   0xd   :  { %4415 = sst [smem:[#allocation42_spill]] %s4386_s13 }
   0xe   :  { %4416 = sst [smem:[#allocation43_spill]] %s4387_s14 }
   0xf   :  { %4417 = sst [smem:[#allocation44_spill]] %s4388_s15 }
  0x10   :  { %4418 = sst [smem:[#allocation45_spill]] %s4390_s17 }
  0x11   :  { %4419 = sst [smem:[#allocation46_spill]] %s4391_s18 }
  0x12   :  { %23 = vsyncpa [#allocation4], 0 }
  0x13   :  { %24 = vsyncpa [#allocation7], 0 }
  0x14   :  { %25 = vsyncpa [#allocation10], 0 }
  0x15   :  { %26 = vsyncpa [#allocation5], 0  ;;  %s3767_s27 = smov 0   ;;  %s3769_s28 = smov 0  }
  0x16   :  { %s3771_s29 = smov 0   ;;  %s3773_s30 = smov 0  }
  0x17 LB: > { %4420 = sst [smem:[#allocation25_spill]] %s3642_s28  ;;  %s3786_s0 = sadd.s32 4294967295, %s3650_s30   ;;  %s3650_s30 = sphi %s3773_s30, %s4464_s30   ;;  %s3646_s29 = sphi %s3771_s29, %s4467_s29   ;;  %s3642_s28 = sphi %s3769_s28, %s4466_s28   ;;  %s3638_s27 = sphi %s3767_s27, %s4465_s27  }
  0x18   : > { %4421 = sst [smem:[#allocation26_spill]] %s3646_s29  ;;  %p136_p0 = scmp.ne.s32.totalorder %s3642_s28, %s3638_s27 }
  0x19   : > { %p137_p1 = scmp.eq.s32.totalorder %s3786_s0, 0  ;;  %p2604_p2 = scmp.ge.s32.totalorder %s3650_s30, 1 }
  0x1a   : > { %p496_p3 = scmp.lt.s32.totalorder %s3650_s30, 3  ;;  %p2605_p4 = scmp.ne.s32.totalorder %s3786_s0, 0 }
  0x1b   : > { %p3795_p5 = por %p137_p1, %p136_p0  ;;  %s4424_s21 = sld [smem:[#allocation30_spill]] }
  0x1c   : > { %p3802_p6 = pnand %p2604_p2, %p496_p3  ;;  %s3652_s23 = smov [#allocation3]  }
  0x1d   : > { %s4422_s19 = scalar_select %p3795_p5, 1, 0 }
  0x1e   : > { %p3058_p7 = pneg %p3802_p6  ;;  %s509_s24 = sshll.u32 %s3652_s23, 4  ;;  %s510_s24 = int_to_ptr.vmem [resolvable:$true] %s509_s24 }
  0x1f   : > { %4423 = sst [smem:[#allocation27_spill]] %s4422_s19  ;;  %s3815_s26 = sadd.s32 1, %s3650_s30  }
  0x20   : > { %p3810_p8 = pnand %p3058_p7, %p137_p1  ;;  %4427 = sst [smem:[#allocation28_spill]] %s3815_s26 }
  0x21   : > { %s507_s22 = sshll.u32 %s4424_s21, 4  ;;  %s4392_s27 = smov 128   ;;  %s508_s22 = int_to_ptr.hbm [resolvable:$true] %s507_s22 }
  0x22   : > { %s4393_s1 = smov 8   ;;  %s120_s20 = ssub.s32 %s3650_s30, %s3815_s26 }
  0x23   : > { %3061 = dma.hbm_to_vmem [thread:$0]  (!%p3810_p8), %s508_s22, 256, %s510_s24, [#allocation4], %s4392_s27, %s4392_s27, %s4393_s1  }
  0x24   : > { %s123_s21 = sadd.s32 1, %s3646_s29  ;;  %p121_p9 = scmp.eq.s32.totalorder %s120_s20, 0 }
  0x25   : > { %p130_p10 = scmp.ne.s32.totalorder %s3646_s29, %s3642_s28  ;;  %p131_p11 = scmp.eq.s32.totalorder %s3650_s30, 0 }
  0x26   : > { %p3098_p12 = scmp.lt.s32.totalorder %s3650_s30, 2  ;;  %s578_s18 = sand.u32 1, %s3650_s30  }
  0x27   : > { %s3830_s23 = scalar_select %p121_p9, %s3646_s29, %s123_s21  }
  0x28   : > { %p132_p13 = por %p131_p11, %p130_p10  ;;  %s3834_s17 = sand.u32 1, %s3646_s29  }
  0x29   : > { %4428 = sst [smem:[#allocation29_spill]] %s3830_s23  ;;  %s3016_s15 = smul.u32 192, %s3834_s17 }
  0x2a   : > { %p3837_p0 = pnand %p3098_p12, %p132_p13  ;;  %s3017_s22 = smul.u32 192, %s3650_s30 }
  0x2b   : > { %s4430_s4 = sld [smem:[#allocation34_spill]]  ;;  %s582_s1 = scalar_lea.vmem [#allocation11], %s3016_s15 }
  0x2c   : > { %s590_s26 = sshll.u32 %s582_s1, 4  ;;  %s3845_s23 = scalar_lea.sflag [#allocation4], %s578_s18  ;;  %s591_s26 = int_to_ptr.vmem [resolvable:$true] %s590_s26 }
  0x2d   : > { %p3849_p3 = pneg %p3837_p0 }
  0x31   : > { %s587_s20 = scalar_lea.hbm %s4430_s4, %s3017_s22  ;;  %s3275_s1 = scalar_lea.hbm %s4430_s4, 384 }
  0x32   : > { %s588_s21 = sshll.u32 %s587_s20, 4  ;;  %s589_s21 = int_to_ptr.hbm [resolvable:$true] %s588_s21 }
  0x33   : > { %s3268_s29 = sshra.s32 %s589_s21, 4  ;;  %s3269_s29 = int_to_ptr.hbm [resolvable:$true] %s3268_s29 }
  0x34   : > { %s3270_s11 = scalar_lea.hbm %s3269_s29, 192  ;;  %p3276_p10 = scmp.lt.s32.totalorder %s3269_s29, %s4430_s4 }
  0x35   : > { %p3271_p2 = scmp.ne.s32.totalorder %s3269_s29, %s3270_s11  ;;  %p3277_p11 = scmp.lt.s32.totalorder %s3275_s1, %s3270_s11 }
  0x37   : > { %p3273_p7 = pnand %p3849_p3, %p3271_p2  ;;  %p3278_p12 = por %p3277_p11, %p3276_p10 }
  0x39   : > { %p3274_p9 = pneg %p3273_p7 }
  0x3b   : > { %p3279_p13 = pnand %p3278_p12, %p3274_p9 }
  0x3d   : > { %3282 = shalt.err (!%p3279_p13)
}
  0x3e   : > { %s3655_s24 = smov 192   ;;  %s3656_s20 = smov 12  }
  0x3f   : > { %3077 = dma.hbm_to_vmem [thread:$0]  (!%p3837_p0), %s589_s21, 3072, %s591_s26, %s3845_s23, %s3655_s24, %s3655_s24, %s3656_s20  }
  0x40   : > { %s3018_s15 = smul.u32 3, %s3834_s17  ;;  %s2612_s9 = sshll.u32 %s3834_s17, 6 }
  0x41   : > { %s3019_s27 = smul.u32 3, %s3650_s30  ;;  %s4432_s5 = sld [smem:[#allocation35_spill]] }
  0x42   : > { %s604_s29 = scalar_lea.vmem [#allocation12], %s3018_s15 }
  0x43   : > { %s612_s1 = sshll.u32 %s604_s29, 4  ;;  %s613_s1 = int_to_ptr.vmem [resolvable:$true] %s612_s1 }
  0x47   : > { %s608_s11 = scalar_lea.hbm %s4432_s5, %s3019_s27  ;;  %s3305_s24 = scalar_lea.hbm %s4432_s5, 6 }
  0x48   : > { %s610_s18 = sshll.u32 %s608_s11, 4  ;;  %s611_s18 = int_to_ptr.hbm [resolvable:$true] %s610_s18 }
  0x49   : > { %s3298_s4 = sshra.s32 %s611_s18, 4  ;;  %s3299_s4 = int_to_ptr.hbm [resolvable:$true] %s3298_s4 }
  0x4a   : > { %s3300_s19 = scalar_lea.hbm %s3299_s4, 3  ;;  %p3306_p10 = scmp.lt.s32.totalorder %s3299_s4, %s4432_s5 }
  0x4b   : > { %p3301_p2 = scmp.ne.s32.totalorder %s3299_s4, %s3300_s19  ;;  %p3307_p11 = scmp.lt.s32.totalorder %s3305_s24, %s3300_s19 }
  0x4d   : > { %p3303_p7 = pnand %p3301_p2, %p3849_p3  ;;  %p3308_p12 = por %p3307_p11, %p3306_p10 }
  0x4f   : > { %p3304_p9 = pneg %p3303_p7 }
  0x51   : > { %p3309_p13 = pnand %p3308_p12, %p3304_p9 }
  0x53   : > { %3312 = shalt.err (!%p3309_p13)
}
  0x54   : > { %3080 = dma.hbm_to_vmem [thread:$0]  (!%p3837_p0), %s611_s18, 48, %s613_s1, %s3845_s23  }
  0x55   : > { %s2941_s7 = sshll.u32 %s3650_s30, 6  ;;  %s623_s15 = scalar_lea.vmem [#allocation13], %s2612_s9 }
  0x56   : > { %s631_s27 = sshll.u32 %s623_s15, 4  ;;  %s4433_s6 = sld [smem:[#allocation36_spill]]  ;;  %s632_s27 = int_to_ptr.vmem [resolvable:$true] %s631_s27 }
  0x57   : > { %s4434_s26 = sld [smem:[#allocation31_spill]] }
  0x5c   : > { %s628_s29 = scalar_lea.hbm %s4433_s6, %s2941_s7  ;;  %s3335_s18 = scalar_lea.hbm %s4433_s6, 128 }
  0x5d   : > { %s629_s28 = sshll.u32 %s628_s29, 4  ;;  %s521_s21 = sshll.u32 %s4434_s26, 4  ;;  %s630_s28 = int_to_ptr.hbm [resolvable:$true] %s629_s28  ;;  %s522_s21 = int_to_ptr.hbm [resolvable:$true] %s521_s21 }
  0x5e   : > { %s3328_s24 = sshra.s32 %s630_s28, 4  ;;  %s3329_s24 = int_to_ptr.hbm [resolvable:$true] %s3328_s24 }
  0x5f   : > { %s3330_s20 = scalar_lea.hbm %s3329_s24, 64  ;;  %p3336_p10 = scmp.lt.s32.totalorder %s3329_s24, %s4433_s6 }
  0x60   : > { %p3331_p2 = scmp.ne.s32.totalorder %s3329_s24, %s3330_s20  ;;  %p3337_p11 = scmp.lt.s32.totalorder %s3335_s18, %s3330_s20 }
  0x62   : > { %p3333_p7 = pnand %p3331_p2, %p3849_p3  ;;  %p3338_p12 = por %p3337_p11, %p3336_p10 }
  0x64   : > { %p3334_p9 = pneg %p3333_p7 }
  0x66   : > { %p3339_p13 = pnand %p3338_p12, %p3334_p9 }
  0x68   : > { %3342 = shalt.err (!%p3339_p13)
}
  0x69   : > { %s4400_s22 = smov 64   ;;  %s3658_s11 = smov 4  }
  0x6a   : > { %3083 = dma.hbm_to_vmem [thread:$0]  (!%p3837_p0), %s630_s28, 1024, %s632_s27, %s3845_s23, %s4400_s22, %s4400_s22, %s3658_s11  }
  0x6b   : > { %s3659_s29 = smov [#allocation6]   ;;  %s3660_s19 = smov 16  }
  0x6c   : > { %s523_s4 = sshll.u32 %s3659_s29, 4  ;;  %s3661_s26 = smov 1   ;;  %s524_s4 = int_to_ptr.vmem [resolvable:$true] %s523_s4 }
  0x6d   : > { %3064 = dma.hbm_to_vmem [thread:$0]  (!%p3810_p8), %s522_s21, 32, %s524_s4, [#allocation7], %s3660_s19, %s3660_s19, %s3661_s26  }
  0x6e   : > { %s4435_s8 = sld [smem:[#allocation38_spill]]  ;;  %s650_s1 = scalar_lea.vmem [#allocation14], %s3834_s17 }
  0x6f   : > { %s657_s18 = sshll.u32 %s650_s1, 4  ;;  %s4436_s27 = sld [smem:[#allocation32_spill]]  ;;  %s658_s18 = int_to_ptr.vmem [resolvable:$true] %s657_s18 }
  0x74   : > { %s653_s9 = scalar_lea.hbm %s4435_s8, %s3650_s30  ;;  %s3395_s19 = scalar_lea.hbm %s4435_s8, 2 }
  0x75   : > { %s655_s7 = sshll.u32 %s653_s9, 4  ;;  %s536_s28 = sshll.u32 %s4436_s27, 4  ;;  %s656_s7 = int_to_ptr.hbm [resolvable:$true] %s655_s7  ;;  %s537_s28 = int_to_ptr.hbm [resolvable:$true] %s536_s28 }
  0x76   : > { %s3388_s29 = sshra.s32 %s656_s7, 4  ;;  %s3389_s29 = int_to_ptr.hbm [resolvable:$true] %s3388_s29 }
  0x77   : > { %s3390_s22 = scalar_lea.hbm %s3389_s29, 1  ;;  %p3396_p10 = scmp.lt.s32.totalorder %s3389_s29, %s4435_s8 }
  0x78   : > { %p3391_p2 = scmp.ne.s32.totalorder %s3389_s29, %s3390_s22  ;;  %p3397_p11 = scmp.lt.s32.totalorder %s3395_s19, %s3390_s22 }
  0x7a   : > { %p3393_p7 = pnand %p3391_p2, %p3849_p3  ;;  %p3398_p12 = por %p3397_p11, %p3396_p10 }
  0x7c   : > { %p3394_p9 = pneg %p3393_p7 }
  0x7e   : > { %p3399_p13 = pnand %p3398_p12, %p3394_p9 }
  0x80   : > { %3402 = shalt.err (!%p3399_p13)
}
  0x81   : > { %3086 = dma.hbm_to_vmem [thread:$0]  (!%p3837_p0), %s656_s7, 16, %s658_s18, %s3845_s23  }
  0x82   : > { %s3662_s5 = smov [#allocation8]   ;;  %s4402_s9 = sshll.u32 %s3834_s17, 7 }
  0x83   : > { %s538_s20 = sshll.u32 %s3662_s5, 4  ;;  %s2942_s22 = sshll.u32 %s3650_s30, 7  ;;  %s539_s20 = int_to_ptr.vmem [resolvable:$true] %s538_s20 }
  0x84   : > { %3067 = dma.hbm_to_vmem [thread:$0]  (!%p3810_p8), %s537_s28, 16, %s539_s20, [#allocation7]  }
  0x85   : > { %s674_s1 = scalar_lea.vmem [#allocation15], %s4402_s9  ;;  %s4437_s10 = sld [smem:[#allocation40_spill]] }
  0x86   : > { %s682_s15 = sshll.u32 %s674_s1, 4  ;;  %s4438_s3 = sld [smem:[#allocation33_spill]]  ;;  %s683_s15 = int_to_ptr.vmem [resolvable:$true] %s682_s15 }
  0x8b   : > { %s679_s21 = scalar_lea.hbm %s4437_s10, %s2942_s22  ;;  %s3455_s20 = scalar_lea.hbm %s4437_s10, 256 }
  0x8c   : > { %s680_s4 = sshll.u32 %s679_s21, 4  ;;  %s548_s19 = sshll.u32 %s4438_s3, 4  ;;  %s681_s4 = int_to_ptr.hbm [resolvable:$true] %s680_s4  ;;  %s549_s19 = int_to_ptr.hbm [resolvable:$true] %s548_s19 }
  0x8d   : > { %s3448_s26 = sshra.s32 %s681_s4, 4  ;;  %s3449_s26 = int_to_ptr.hbm [resolvable:$true] %s3448_s26 }
  0x8e   : > { %s3450_s28 = scalar_lea.hbm %s3449_s26, 128  ;;  %p3456_p10 = scmp.lt.s32.totalorder %s3449_s26, %s4437_s10 }
  0x8f   : > { %p3451_p2 = scmp.ne.s32.totalorder %s3449_s26, %s3450_s28  ;;  %p3457_p11 = scmp.lt.s32.totalorder %s3455_s20, %s3450_s28 }
  0x91   : > { %p3453_p7 = pnand %p3451_p2, %p3849_p3  ;;  %p3458_p12 = por %p3457_p11, %p3456_p10 }
  0x93   : > { %p3454_p9 = pneg %p3453_p7 }
  0x95   : > { %p3459_p13 = pnand %p3458_p12, %p3454_p9 }
  0x97   : > { %3462 = shalt.err (!%p3459_p13)
}
  0x98   : > { %s4439_s29 = smov 8   ;;  %s4440_s21 = smov 128  }
  0x99   : > { %3089 = dma.hbm_to_vmem [thread:$0]  (!%p3837_p0), %s681_s4, 2048, %s683_s15, %s3845_s23, %s4440_s21, %s4440_s21, %s4439_s29  }
  0x9a   : > { %s559_s24 = sshll.u32 %s4389_s16, 4  ;;  %s3663_s26 = smov [#allocation9]   ;;  %s560_s24 = int_to_ptr.hbm [resolvable:$true] %s559_s24 }
  0x9b   : > { %s550_s28 = sshll.u32 %s3663_s26, 4  ;;  %s3664_s5 = smov [#allocation17]   ;;  %s551_s28 = int_to_ptr.vmem [resolvable:$true] %s550_s28 }
  0x9c   : > { %3070 = dma.hbm_to_vmem [thread:$0]  (!%p3810_p8), %s549_s19, 16, %s551_s28, [#allocation10]  }
  0x9d   : > { %s561_s20 = sshll.u32 %s3664_s5, 4  ;;  %s708_s9 = scalar_lea.hbm %s4385_s12, %s2942_s22  ;;  %s562_s20 = int_to_ptr.vmem [resolvable:$true] %s561_s20 }
  0x9e   : > { %s4441_s15 = smov 64   ;;  %s709_s4 = sshll.u32 %s708_s9, 4  ;;  %s710_s4 = int_to_ptr.hbm [resolvable:$true] %s709_s4 }
  0x9f   : > { %3073 = dma.hbm_to_vmem [thread:$0]  (!%p3810_p8), %s560_s24, 1024, %s562_s20, [#allocation7], %s4441_s15, %s4441_s15, %s3658_s11  }
  0xa0   : > { %s4442_s29 = sshll.u32 %s3834_s17, 7  ;;  %s3538_s19 = sshra.s32 %s710_s4, 4  ;;  %s3539_s19 = int_to_ptr.hbm [resolvable:$true] %s3538_s19 }
  0xa1   : > { %s703_s21 = scalar_lea.vmem [#allocation16], %s4442_s29  ;;  %s3540_s7 = scalar_lea.hbm %s3539_s19, 128 }
  0xa2   : > { %s711_s18 = sshll.u32 %s703_s21, 4  ;;  %p3541_p2 = scmp.ne.s32.totalorder %s3539_s19, %s3540_s7  ;;  %s712_s18 = int_to_ptr.vmem [resolvable:$true] %s711_s18 }
  0xa3   : > { %s3545_s25 = scalar_lea.hbm %s4385_s12, 256  ;;  %p3546_p8 = scmp.lt.s32.totalorder %s3539_s19, %s4385_s12 }
  0xa4   : > { %p3543_p7 = pnand %p3541_p2, %p3849_p3  ;;  %p3547_p10 = scmp.lt.s32.totalorder %s3545_s25, %s3540_s7 }
  0xa6   : > { %p3544_p9 = pneg %p3543_p7  ;;  %p3548_p11 = por %p3547_p10, %p3546_p8 }
  0xa8   : > { %p3549_p12 = pnand %p3548_p11, %p3544_p9 }
  0xaa   : > { %3552 = shalt.err (!%p3549_p12)
}
  0xab   : > { %3092 = dma.hbm_to_vmem [thread:$0]  (!%p3837_p0), %s710_s4, 2048, %s712_s18, %s3845_s23, %s4441_s15, %s4441_s15, %s3658_s11  }
  0xac   : > { %741 = sbr.rel (%p3802_p6) target bundleno = 3015 (0xbc7), region = 92 }
  0xb1   : > { %3613 = dma.done.wait (%p137_p1), [#allocation4], 256  }
  0xb2   : > { %3615 = vsyncadd (%p137_p1), [#allocation4], 4294967040 }
  0xb3   : > { %3617 = dma.done.wait (%p137_p1), [#allocation7], 48  }
  0xb4   : > { %3619 = vsyncadd (%p137_p1), [#allocation7], 4294967248 }
  0xb5   : > { %3621 = dma.done.wait (%p137_p1), [#allocation10], 16  }
  0xb6   : > { %3623 = vsyncadd (%p137_p1), [#allocation10], 4294967280  ;;  %s4443_s13 = sld [smem:[#allocation25_spill]]  ;;  %s763_s17 = sand.u32 1, %s3786_s0  }
  0xb7   : > { %s764_s11 = scalar_lea.sflag [#allocation4], %s763_s17 }
  0xbc   : > { %s3998_s2 = sand.u32 1, %s4443_s13  }
  0xbd   : > { %s3020_s23 = smul.u32 192, %s3998_s2 }
  0xbf   : > { %s4001_s9 = scalar_lea.vmem [#allocation11], %s3020_s23 }
  0xc0   : > { %3625 = dma.done.wait (%p3795_p5), %s764_s11, 8256  }
  0xc1   : > { %3627 = vsyncadd (%p3795_p5), %s764_s11, 4294959040  ;;  %s3021_s24 = smul.u32 3, %s3998_s2  ;;  %s2626_s5 = sshll.u32 %s3998_s2, 6 }
  0xc2   : > { %s2627_s20 = sshll.u32 %s3998_s2, 7  ;;  %s4012_s27 = scalar_lea.vmem [#allocation13], %s2626_s5 }
  0xc3   : > { %s4010_s1 = scalar_lea.vmem [#allocation12], %s3021_s24  ;;  %s4015_s4 = scalar_lea.vmem [#allocation15], %s2627_s20 }
  0xc4   : > { %s4017_s29 = scalar_lea.vmem [#allocation16], %s2627_s20 }
  0xc5   : > { %3629 = dma.done.wait (%p137_p1), [#allocation7], 1024  }
  0xc6   : > { %3631 = vsyncadd (%p137_p1), [#allocation7], 4294966272  ;;  %p913_p5 = scmp.lt.s32.totalorder %s3786_s0, 1  ;;  %s4446_s26 = sld [smem:[#allocation39_spill]] }
  0xc7   : > { %s4447_s23 = sld [smem:[#allocation42_spill]] }
  0xc8   : > { %s4025_s21 = scalar_select %p913_p5, %s3786_s0, 1 }
  0xc9   : > { %s4448_s20 = sld [smem:[#allocation41_spill]] }
  0xca   : > { %s2630_s13 = sshll.u32 %s4025_s21, 1  ;;  %s4449_s3 = sld [smem:[#allocation43_spill]] }
  0xcb   : > { %s4450_s30 = sld [smem:[#allocation44_spill]] }
  0xcc   : > { %s918_s28 = scalar_lea.vmem %s4446_s26, %s4025_s21 }
  0xcd   : > { %s925_s11 = scalar_lea.vmem %s4447_s23, %s4025_s21  ;;  %936 = sbr.rel (%p2605_p4) target bundleno = 486 (0x1e6), region = 140 }
  0xcf   : > { %s4043_s15 = scalar_lea.vmem %s4448_s20, %s2630_s13 }
  0xd0   : > { %s928_s6 = scalar_lea.vmem %s4449_s3, %s4025_s21 }
  0xd1   : > { %s931_s10 = scalar_lea.vmem %s4450_s30, %s4025_s21 }
  0xd2   : > { %v937_v0 = vld [vmem:[#allocation3] sm:$0xff]  ;;  %v938_v1 = vld [vmem:[#allocation3 + $0x8] sm:$0xff]  ;;  %v3665_v2 = vmov 128.0   ;;  %v3158_v31 = vld [vmem:[#allocation8] ss:$0 sm:$0xff] }
  0xd3   : > { %941 = vadd.xlane.f32.xlu0 %v937_v0  ;;  %3160 = vrcp.f32 %v3665_v2  ;;  %v3159_v34 = vld [vmem:[#allocation9] ss:$0 sm:$0xff] }
  0xd9   : > { %v3161_v3 = vpop.eup %3160 }
  0xda   : > { %v946_v4 = vmul.f32 128.0, %v3161_v3  ;;  %vm950_vm0 = vweird.f32 %v3161_v3 }
  0xdb   : > { %943 = vadd.xlane.f32.xlu0 %v938_v1 }
  0xdc   : > { %v947_v5 = vsub.f32 1.0, %v946_v4 }
  0xde   : > { %v948_v6 = vmul.f32 %v3161_v3, %v947_v5 }
  0xe0   : > { %v949_v7 = vadd.f32 %v3161_v3, %v948_v6 }
  0xe2   : > { %v951_v8 = vsel %vm950_vm0, %v3161_v3, %v949_v7 }
 0x146   : > { %v942_v9 = vpop.xlane.xlu0 %941 }
 0x147   : > { %v952_v10 = vmul.f32 %v951_v8, %v942_v9 }
 0x149   : > { %v954_v11 = vsub.f32 %v937_v0, %v952_v10 }
 0x14b   : > { %v956_v12 = vmul.f32 %v954_v11, %v954_v11 }
 0x14d   : > { %958 = vadd.xlane.f32.xlu1 %v956_v12 }
 0x14e   : > { %v944_v13 = vpop.xlane.xlu0 %943 }
 0x14f   : > { %v953_v14 = vmul.f32 %v951_v8, %v944_v13 }
 0x151   : > { %v955_v15 = vsub.f32 %v938_v1, %v953_v14 }
 0x153   : > { %v957_v16 = vmul.f32 %v955_v15, %v955_v15 }
 0x155   : > { %960 = vadd.xlane.f32.xlu1 %v957_v16 }
 0x1c0   : > { %v959_v17 = vpop.xlane.xlu1 %958 }
 0x1c1   : > { %v962_v18 = vmul.f32 %v959_v17, %v951_v8 }
 0x1c3   : > { %v964_v19 = vadd.f32 1e-12, %v962_v18 }
 0x1c5   : > { %3162 = vrsqrt.f32 %v964_v19  ;;  %vm972_vm2 = vweird.f32 %v964_v19 }
 0x1c8   : > { %v961_v20 = vpop.xlane.xlu1 %960 }
 0x1c9   : > { %v963_v21 = vmul.f32 %v961_v20, %v951_v8 }
 0x1cb   : > { %v3163_v22 = vpop.eup %3162  ;;  %v965_v23 = vadd.f32 1e-12, %v963_v21 }
 0x1cc   : > { %v967_v24 = vmul.f32 %v3163_v22, %v964_v19  ;;  %vm973_vm1 = vweird.f32 %v3163_v22 }
 0x1cd   : > { %3164 = vrsqrt.f32 %v965_v23  ;;  %vm974_vm3 = vmor %vm972_vm2, %vm973_vm1  ;;  %vm982_vm5 = vweird.f32 %v965_v23 }
 0x1ce   : > { %v968_v25 = vmul.f32 %v3163_v22, %v967_v24 }
 0x1d0   : > { %v969_v26 = vmul.f32 0.5, %v968_v25 }
 0x1d2   : > { %v970_v27 = vsub.f32 1.5, %v969_v26 }
 0x1d3   : > { %v3165_v28 = vpop.eup %3164 }
 0x1d4   : > { %v971_v29 = vmul.f32 %v3163_v22, %v970_v27  ;;  %v977_v30 = vmul.f32 %v3165_v28, %v965_v23  ;;  %vm983_vm4 = vweird.f32 %v3165_v28 }
 0x1d5   : > { %vm984_vm6 = vmor %vm982_vm5, %vm983_vm4 }
 0x1d6   : > { %v975_v32 = vsel %vm974_vm3, %v3163_v22, %v971_v29  ;;  %v978_v33 = vmul.f32 %v3165_v28, %v977_v30 }
 0x1d7   : > { %v986_v35 = vmul.f32 %v975_v32, %v954_v11 }
 0x1d8   : > { %v979_v36 = vmul.f32 0.5, %v978_v33 }
 0x1d9   : > { %v991_v37 = vmul.f32 %v3158_v31, %v986_v35 }
 0x1da   : > { %v980_v38 = vsub.f32 1.5, %v979_v36 }
 0x1db   : > { %v996_v39 = vadd.f32 %v3159_v34, %v991_v37 }
 0x1dc   : > { %v981_v40 = vmul.f32 %v3165_v28, %v980_v38 }
 0x1dd   : > { %998 = vst [vmem:[#allocation2] sm:$0xff] %v996_v39 }
 0x1de   : > { %v985_v41 = vsel %vm984_vm6, %v3165_v28, %v981_v40 }
 0x1df   : > { %v987_v42 = vmul.f32 %v985_v41, %v955_v15 }
 0x1e1   : > { %v992_v43 = vmul.f32 %v3158_v31, %v987_v42 }
 0x1e3   : > { %v997_v44 = vadd.f32 %v3159_v34, %v992_v43 }
 0x1e5   : > { %999 = vst [vmem:[#allocation2 + $0x8] sm:$0xff] %v997_v44 }
 0x1e6 PF: > { %v2718_v45 = vld [vmem:[%s4001_s9 + $0xa8] sm:$0xf]  ;;  %v2966_v46 = vld [vmem:[%s4001_s9 + $0xb0] sm:$0xf0]  ;;  %v2965_v47 = vld [vmem:[%s4001_s9 + $0xac] sm:$0xf] }
 0x1e7   : > { %v2719_v48 = vor.u32 %v2966_v46, %v2718_v45  ;;  %v2720_v49 = vld [vmem:[%s4001_s9 + $0xb4] sm:$0xf0]  ;;  %v2706_v50 = vld [vmem:[%s4001_s9 + $0x90] sm:$0xf]  ;;  %v2963_v51 = vld [vmem:[%s4001_s9 + $0x98] sm:$0xf0] }
 0x1e8   : > { %v2723_v52 = vor.u32 %v2965_v47, %v2720_v49  ;;  %v2962_v53 = vld [vmem:[%s4001_s9 + $0x94] sm:$0xf]  ;;  %v2708_v54 = vld [vmem:[%s4001_s9 + $0x9c] sm:$0xf0]  ;;  %v2707_v55 = vor.u32 %v2963_v51, %v2706_v50  ;;  %v2694_v57 = vld [vmem:[%s4001_s9 + $0x78] sm:$0xf] }
 0x1e9   : > { %1171 = vmatpush.bf16.msra.mxu0 %v2719_v48  ;;  %v2711_v56 = vor.u32 %v2962_v53, %v2708_v54  ;;  %v2960_v58 = vld [vmem:[%s4001_s9 + $0x80] sm:$0xf0]  ;;  %v2959_v59 = vld [vmem:[%s4001_s9 + $0x7c] sm:$0xf]  ;;  %v2696_v60 = vld [vmem:[%s4001_s9 + $0x84] sm:$0xf0] }
 0x1ea   : > { %1185 = vmatpush.bf16.msra.mxu1 %v2723_v52  ;;  %v2695_v61 = vor.u32 %v2960_v58, %v2694_v57  ;;  %v2699_v62 = vor.u32 %v2959_v59, %v2696_v60  ;;  %v2682_v63 = vld [vmem:[%s4001_s9 + $0x60] sm:$0xf]  ;;  %v2957_v0 = vld [vmem:[%s4001_s9 + $0x68] sm:$0xf0]  ;;  %v2956_v1 = vld [vmem:[%s4001_s9 + $0x64] sm:$0xf] }
 0x1eb   : > { %v2684_v2 = vld [vmem:[%s4001_s9 + $0x6c] sm:$0xf0]  ;;  %v2683_v3 = vor.u32 %v2957_v0, %v2682_v63  ;;  %v2670_v4 = vld [vmem:[%s4001_s9 + $0x48] sm:$0xf]  ;;  %v2967_v6 = vld [vmem:[%s4001_s9 + $0xb8] sm:$0xf0] }
 0x1ec   : > { %v2726_v5 = vld [vmem:[%s4001_s9 + $0xb0] sm:$0xf]  ;;  %v2687_v7 = vor.u32 %v2956_v1, %v2684_v2  ;;  %v2954_v8 = vld [vmem:[%s4001_s9 + $0x50] sm:$0xf0]  ;;  %v2714_v10 = vld [vmem:[%s4001_s9 + $0x98] sm:$0xf] }
 0x1ed   : > { %1172 = vmatpush.bf16.msra.mxu0 %v2707_v55  ;;  %v2727_v9 = vor.u32 %v2967_v6, %v2726_v5  ;;  %v2964_v11 = vld [vmem:[%s4001_s9 + $0xa0] sm:$0xf0]  ;;  %v2953_v12 = vld [vmem:[%s4001_s9 + $0x4c] sm:$0xf]  ;;  %v2672_v13 = vld [vmem:[%s4001_s9 + $0x54] sm:$0xf0]  ;;  %v2671_v15 = vor.u32 %v2954_v8, %v2670_v4 }
 0x1ee   : > { %1186 = vmatpush.bf16.msra.mxu1 %v2711_v56  ;;  %v2715_v14 = vor.u32 %v2964_v11, %v2714_v10  ;;  %v2702_v16 = vld [vmem:[%s4001_s9 + $0x80] sm:$0xf]  ;;  %v2961_v17 = vld [vmem:[%s4001_s9 + $0x88] sm:$0xf0]  ;;  %v2675_v18 = vor.u32 %v2953_v12, %v2672_v13  ;;  %v2658_v19 = vld [vmem:[%s4001_s9 + $0x30] sm:$0xf] }
 0x1ef   : > { %1199 = vmatpush.bf16.msra.mxu2 %v2727_v9  ;;  %v2951_v20 = vld [vmem:[%s4001_s9 + $0x38] sm:$0xf0]  ;;  %v2950_v21 = vld [vmem:[%s4001_s9 + $0x34] sm:$0xf]  ;;  %v2660_v22 = vld [vmem:[%s4001_s9 + $0x3c] sm:$0xf0]  ;;  %v2703_v23 = vor.u32 %v2961_v17, %v2702_v16 }
 0x1f0   : > { %v2659_v24 = vor.u32 %v2951_v20, %v2658_v19  ;;  %v2690_v25 = vld [vmem:[%s4001_s9 + $0x68] sm:$0xf]  ;;  %v2958_v26 = vld [vmem:[%s4001_s9 + $0x70] sm:$0xf0]  ;;  %v2663_v27 = vor.u32 %v2950_v21, %v2660_v22  ;;  %v2646_v28 = vld [vmem:[%s4001_s9 + $0x18] sm:$0xf] }
 0x1f1   : > { %1173 = vmatpush.bf16.msra.mxu0 %v2695_v61  ;;  %v2948_v29 = vld [vmem:[%s4001_s9 + $0x20] sm:$0xf0]  ;;  %v2947_v30 = vld [vmem:[%s4001_s9 + $0x1c] sm:$0xf]  ;;  %v2648_v31 = vld [vmem:[%s4001_s9 + $0x24] sm:$0xf0]  ;;  %v2691_v32 = vor.u32 %v2958_v26, %v2690_v25 }
 0x1f2   : > { %1187 = vmatpush.bf16.msra.mxu1 %v2699_v62  ;;  %v2647_v33 = vor.u32 %v2948_v29, %v2646_v28  ;;  %v2678_v34 = vld [vmem:[%s4001_s9 + $0x50] sm:$0xf]  ;;  %v2955_v35 = vld [vmem:[%s4001_s9 + $0x58] sm:$0xf0]  ;;  %v2651_v36 = vor.u32 %v2947_v30, %v2648_v31  ;;  %v2634_v37 = vld [vmem:[%s4001_s9] sm:$0xf] }
 0x1f3   : > { %1200 = vmatpush.bf16.msra.mxu2 %v2715_v14  ;;  %v2945_v38 = vld [vmem:[%s4001_s9 + $0x8] sm:$0xf0]  ;;  %v2944_v39 = vld [vmem:[%s4001_s9 + $0x4] sm:$0xf]  ;;  %v2636_v40 = vld [vmem:[%s4001_s9 + $0xc] sm:$0xf0]  ;;  %v2679_v42 = vor.u32 %v2955_v35, %v2678_v34 }
 0x1f4   : > { %v4097_v41 = vld [vmem:[#allocation2] sm:$0xff]  ;;  %v2635_v43 = vor.u32 %v2945_v38, %v2634_v37  ;;  %v4099_v44 = vld [vmem:[#allocation2 + $0x8] sm:$0xff]  ;;  %v2639_v47 = vor.u32 %v2944_v39, %v2636_v40  ;;  %v2949_v51 = vld [vmem:[%s4001_s9 + $0x28] sm:$0xf0]  ;;  %vm1217_vm7 = vcmask 261120   ;;  %s3666_s3 = smov 64  }
 0x1f5   : > { %1174 = vmatpush.bf16.msra.mxu0 %v2683_v3  ;;  %v2666_v45 = vld [vmem:[%s4001_s9 + $0x38] sm:$0xf]  ;;  %v2952_v46 = vld [vmem:[%s4001_s9 + $0x40] sm:$0xf0]  ;;  %v1002_v48 = vpack.c.bf16 %v4099_v44, %v4097_v41  ;;  %v2654_v50 = vld [vmem:[%s4001_s9 + $0x20] sm:$0xf] }
 0x1f6   : > { %1188 = vmatpush.bf16.msra.mxu1 %v2687_v7  ;;  %v2667_v49 = vor.u32 %v2952_v46, %v2666_v45  ;;  %v2655_v52 = vor.u32 %v2949_v51, %v2654_v50  ;;  %v2642_v53 = vld [vmem:[%s4001_s9 + $0x8] sm:$0xf]  ;;  %v2946_v54 = vld [vmem:[%s4001_s9 + $0x10] sm:$0xf0]  ;;  %v4110_v56 = vld [vmem:[%s4010_s1] sm:$0x7] }
 0x1f7   : > { %1201 = vmatpush.bf16.msra.mxu2 %v2703_v23  ;;  %v2643_v55 = vor.u32 %v2946_v54, %v2642_v53  ;;  %v1038_v57 = vperm.slane %v4110_v56, 1  ;;  %v1037_v59 = vperm.slane %v4110_v56, 0  ;;  %s3667_s8 = smov 96   ;;  %s3668_s9 = smov 32   ;;  %v1039_v9 = vperm.slane %v4110_v56, 2 }
 0x1f8   : > { %vm1259_vm8 = vcmask 1043456   ;;  %v1213_v23 = vld [vmem:[#allocation6] sm:$0x1]  ;;  %vm1243_vm11 = vcmask 64512   ;;  %vm1466_vm14 = vcmask 523264   ;;  %vm1468_vm15 = vcmask 785408  }
 0x1f9   : > { %1175 = vmatpush.bf16.msra.mxu0 %v2671_v15  ;;  %vm1238_vm9 = vcmp.gt.f32.partialorder %v1213_v23, 0.0  ;;  %s4455_s30 = sld [smem:[#allocation37_spill]]  ;;  %p2904_p1 = scmp.ne.s32.totalorder %s3786_s0, 1 }
 0x1fa   : > { %1189 = vmatpush.bf16.msra.mxu1 %v2675_v18 }
 0x1fb   : > { %1202 = vmatpush.bf16.msra.mxu2 %v2691_v32 }
 0x1fd   : > { %1176 = vmatpush.bf16.msra.mxu0 %v2659_v24  ;;  %v3669_v24 = vmov 0  }
 0x1fe   : > { %1190 = vmatpush.bf16.msra.mxu1 %v2663_v27  ;;  %v1239_v25 = vsel %vm1238_vm9, 1, %v3669_v24 }
 0x1ff   : > { %1203 = vmatpush.bf16.msra.mxu2 %v2679_v42  ;;  %v1240_v26 = vperm.slane %v1239_v25, 0  ;;  %s4456_s22 = scalar_lea.vmem %s4455_s30, %s4025_s21  ;;  %s4462_s21 = sld [smem:[#allocation45_spill]] (!%p2904_p1) }
 0x201   : > { %1177 = vmatpush.bf16.msra.mxu0 %v2647_v33  ;;  %vm4139_vm10 = vcmp.eq.s32.totalorder %v1240_v26, 1 }
 0x202   : > { %1191 = vmatpush.bf16.msra.mxu1 %v2651_v36 }
 0x203   : > { %1204 = vmatpush.bf16.msra.mxu2 %v2667_v49 }
 0x205   : > { %1178 = vmatpush.bf16.msra.mxu0 %v2635_v43  ;;  %v1471_v43 = vld [vmem:[#allocation6 + $0x1] sm:$0x1] }
 0x206   : > { %1192 = vmatpush.bf16.msra.mxu1 %v2639_v47  ;;  %vm1495_vm12 = vcmp.gt.f32.partialorder %v1471_v43, 0.0 }
 0x207   : > { %1205 = vmatpush.bf16.msra.mxu2 %v2655_v52  ;;  %v1496_v45 = vsel %vm1495_vm12, 1, %v3669_v24 }
 0x208   : > { %1179 = vmatmul.bf16.vlgmr.msra.gmra.mxu0 %v1002_v48  ;;  %v1497_v46 = vperm.slane %v1496_v45, 0 }
 0x209   : > { %1193 = vmatmul.bf16.vlgmr.msra.gmra.mxu1 %v1002_v48 }
 0x20a   : > { %vm4149_vm13 = vcmp.eq.s32.totalorder %v1497_v46, 1 }
 0x20b   : > { %1206 = vmatpush.bf16.msra.mxu2 %v2643_v55 }
 0x20e   : > { %1207 = vmatmul.bf16.vlgmr.msra.gmra.mxu2 %v1002_v48 }
 0x285   : > { %v1180_v61 = vpop.f32.mrf.mxu0 }
 0x286   : > { %v1194_v58 = vpop.f32.mrf.mxu1  ;;  %v1181_v63 = vadd.f32 %v1180_v61, %v1037_v59 }
 0x287   : > { %v1195_v60 = vadd.f32 %v1194_v58, %v1038_v57 }
 0x288   : > { %v1214_v2 = vpack.c.bf16 %v1181_v63, %v1181_v63 }
 0x289   : > { %v1215_v62 = vpack.c.bf16 %v1195_v60, %v1195_v60 }
 0x28b   : > { %1339 = vrot.lane.b32.xlu2 %v1215_v62, %s3666_s3  ;;  %1280 = vrot.lane.b32.xlu1 %v1215_v62, %s3667_s8  ;;  %v1222_v0 = vsel %vm1217_vm7, %v1215_v62, 0 }
 0x28c   : > { %1231 = vmatpush.bf16.xpose.msra.mxu3 %v1222_v0 }
 0x28d   : > { %v1182_v5 = vpop.f32.mrf.mxu0 }
 0x28e   : > { %v1196_v1 = vpop.f32.mrf.mxu1  ;;  %v1183_v7 = vadd.f32 %v1182_v5, %v1037_v59 }
 0x28f   : > { %v1197_v3 = vadd.f32 %v1196_v1, %v1038_v57 }
 0x290   : > { %v1472_v8 = vpack.c.bf16 %v1183_v7, %v1183_v7 }
 0x291   : > { %v1473_v4 = vpack.c.bf16 %v1197_v3, %v1197_v3  ;;  %v1208_v10 = vpop.f32.mrf.mxu2 }
 0x292   : > { %v1209_v11 = vadd.f32 %v1208_v10, %v1039_v9 }
 0x293   : > { %1397 = vrot.lane.b32.xlu2 %v1215_v62, %s3668_s9  ;;  %1277 = vrot.lane.b32.xlu1 %v1214_v2, %s3667_s8  ;;  %v1479_v6 = vsel %vm1217_vm7, %v1473_v4, 0 }
 0x294   : > { %2728 = vmatmul.msk.bf16.vlgmr.msra.gmra.mxu3 %vm1217_vm7, %v1214_v2  ;;  %1488 = vmatpush.bf16.xpose.msrb.mxu1 %v1479_v6  ;;  %v4131_v12 = vpack.c.bf16 %v1209_v11, %v1209_v11 }
 0x296   : > { %v1261_v13 = vsel %vm1259_vm8, %v4131_v12, 0 }
 0x297   : > { %1270 = vmatpush.bf16.msrb.mxu3 %v1261_v13 }
 0x299   : > { %v4168_v1 = vpop.f32.mrf.mxu2 }
 0x29b   : > { %1535 = vrot.lane.b32.xlu2 %v1473_v4, %s3667_s8  ;;  %2736 = vmatmul.msk.bf16.vlgmr.msrb.gmra.mxu1 %vm1217_vm7, %v1472_v8 }
 0x29c   : > { %1395 = vrot.lane.b32.xlu1 %v1214_v2, %s3668_s9 }
 0x2a3   : > { %1594 = vrot.lane.b32.xlu2 %v1473_v4, %s3666_s3 }
 0x2a4   : > { %1532 = vrot.lane.b32.xlu1 %v1472_v8, %s3667_s8 }
 0x2ab   : > { %1592 = vrot.lane.b32.xlu2 %v1472_v8, %s3666_s3 }
 0x2ac   : > { %1652 = vrot.lane.b32.xlu1 %v1473_v4, %s3668_s9 }
 0x2e5   : > { %v1340_v14 = vpop.permute.xlu2 %1339 }
 0x2e6   : > { %v1345_v15 = vsel %vm1217_vm7, %v1340_v14, 0 }
 0x2e7   : > { %1354 = vmatpush.bf16.xpose.msrb.mxu2 %v1345_v15 }
 0x2ed   : > { %v1398_v16 = vpop.permute.xlu2 %1397 }
 0x2ee   : > { %v1403_v57 = vsel %vm1217_vm7, %v1398_v16, 0 }
 0x2f5   : > { %v1536_v17 = vpop.permute.xlu2 %1535 }
 0x2f6   : > { %v1541_v60 = vsel %vm1217_vm7, %v1536_v17, 0 }
 0x2fd   : > { %v1595_v18 = vpop.permute.xlu2 %1594  ;;  %v1281_v19 = vpop.permute.xlu1 %1280 }
 0x2fe   : > { %v1600_v20 = vsel %vm1217_vm7, %v1595_v18, 0  ;;  %v1286_v21 = vsel %vm1217_vm7, %v1281_v19, 0 }
 0x2ff   : > { %1295 = vmatpush.bf16.xpose.msra.mxu3 %v1286_v21  ;;  %1609 = vmatpush.bf16.xpose.msra.mxu1 %v1600_v20 }
 0x305   : > { %v1593_v22 = vpop.permute.xlu2 %1592  ;;  %v1278_v55 = vpop.permute.xlu1 %1277 }
 0x306   : > { %2740 = vmatmul.msk.bf16.vlgmr.msra.gmra.mxu1 %vm1217_vm7, %v1593_v22 }
 0x30e   : > { %v1396_v59 = vpop.permute.xlu1 %1395 }
 0x316   : > { %v1533_v61 = vpop.permute.xlu1 %1532 }
 0x317   : > { %v1233_v27 = vpop.f32.mrf.mxu3 }
 0x318   : > { %v1237_v29 = vmul.f32 0.17677669, %v1233_v27  ;;  %v1490_v30 = vpop.f32.mrf.mxu1 }
 0x31a   : > { %v1242_v31 = vsel %vm4139_vm10, %v1237_v29, -3.4028235e+38 }
 0x31b   : > { %v1244_v32 = vsel %vm1243_vm11, %v1242_v31, -inf }
 0x31c   : > { %1245 = vmax.xlane.f32.xlu0 %v1244_v32 }
 0x31e   : > { %v1653_v62 = vpop.permute.xlu1 %1652 }
 0x31f   : > { %v1235_v33 = vpop.f32.mrf.mxu3  ;;  %v1658_v63 = vsel %vm1217_vm7, %v1653_v62, 0 }
 0x320   : > { %v1492_v34 = vpop.f32.mrf.mxu1 }
 0x383   : > { %v1611_v35 = vpop.f32.mrf.mxu1 }
 0x384   : > { %v1615_v47 = vmul.f32 0.17677669, %v1611_v35 }
 0x386   : > { %v4155_v49 = vsel %vm4149_vm13, %v1615_v47, -3.4028235e+38 }
 0x387   : > { %v1617_v50 = vsel %vm1243_vm11, %v4155_v49, -inf }
 0x38b   : > { %v1613_v36 = vpop.f32.mrf.mxu1 }
 0x38f   : > { %v1246_v37 = vpop.xlane.xlu0 %1245 }
 0x390   : > { %v1247_v38 = vsub.f32 %v1242_v31, %v1246_v37 }
 0x392   : > { %v1248_v39 = vmul.f32 1.442695, %v1247_v38 }
 0x394   : > { %3187 = vpow2.f32 %v1248_v39 }
 0x39a   : > { %v3188_v40 = vpop.eup %3187 }
 0x39b   : > { %v1250_v42 = vsel %vm1243_vm11, %v3188_v40, 0.0 }
 0x39c   : > { %1251 = vadd.xlane.f32.xlu0 %v1250_v42 }
 0x3b0   : > { %1337 = vrot.lane.b32.xlu0 %v1214_v2, %s3666_s3 }
 0x3b8   : > { %1650 = vrot.lane.b32.xlu0 %v1472_v8, %s3668_s9  ;;  %v1494_v8 = vmul.f32 0.17677669, %v1490_v30 }
 0x3ba   : > { %v1499_v14 = vsel %vm4149_vm13, %v1494_v8, -3.4028235e+38 }
 0x3bb   : > { %v1500_v16 = vsel %vm1243_vm11, %v1499_v14, -inf }
 0x3e2   : > { %1618 = vmax.xlane.f32.xlu0 %v1617_v50 }
 0x40f   : > { %v1252_v51 = vpop.xlane.xlu0 %1251 }
 0x410   : > { %3189 = vrcp.f32 %v1252_v51 }
 0x416   : > { %v3190_v52 = vpop.eup %3189 }
 0x417   : > { %v1254_v53 = vmul.f32 %v3190_v52, %v3188_v40 }
 0x419   : > { %v1255_v54 = vpack.c.bf16 %v1254_v53, %v1254_v53 }
 0x41b   : > { %2729 = vmatmul.msk.bf16.vlgmr.msrb.gmra.mxu3 %vm1243_vm11, %v1255_v54 }
 0x41c   : > { %1412 = vmatpush.bf16.xpose.msrb.mxu3 %v1403_v57 }
 0x422   : > { %v1338_v58 = vpop.permute.xlu0 %1337 }
 0x423   : > { %2732 = vmatmul.msk.bf16.vlgmr.msrb.gmra.mxu2 %vm1217_vm7, %v1338_v58 }
 0x42a   : > { %v1651_v0 = vpop.permute.xlu0 %1650 }
 0x42b   : > { %2730 = vmatmul.msk.bf16.vlgmr.msra.gmra.mxu3 %vm1217_vm7, %v1278_v55 }
 0x42c   : > { %1550 = vmatpush.bf16.xpose.msra.mxu3 %v1541_v60 }
 0x43b   : > { %2734 = vmatmul.msk.bf16.vlgmr.msrb.gmra.mxu3 %vm1217_vm7, %v1396_v59 }
 0x43c   : > { %1667 = vmatpush.bf16.xpose.msrb.mxu3 %v1658_v63 }
 0x44b   : > { %2738 = vmatmul.msk.bf16.vlgmr.msra.gmra.mxu3 %vm1217_vm7, %v1533_v61  ;;  %v1211_v61 = vadd.f32 %v4168_v1, %v1039_v9 }
 0x44d   : > { %v1474_v63 = vpack.c.bf16 %v1211_v61, %v1211_v61 }
 0x455   : > { %v1619_v45 = vpop.xlane.xlu0 %1618 }
 0x45b   : > { %2742 = vmatmul.msk.bf16.vlgmr.msrb.gmra.mxu3 %vm1217_vm7, %v1651_v0 }
 0x49e   : > { %v4170_v2 = vpop.f32.mrf.mxu3 }
 0x4a6   : > { %v1274_v3 = vpop.f32.mrf.mxu3  ;;  %v1356_v4 = vpop.f32.mrf.mxu2 }
 0x4a7   : > { %v1360_v5 = vmul.f32 0.17677669, %v1356_v4 }
 0x4a9   : > { %v1361_v6 = vsel %vm4139_vm10, %v1360_v5, -3.4028235e+38 }
 0x4aa   : > { %v1362_v7 = vsel %vm1243_vm11, %v1361_v6, -inf }
 0x4ab   : > { %1363 = vmax.xlane.f32.xlu2 %v1362_v7 }
 0x4ae   : > { %v1297_v10 = vpop.f32.mrf.mxu3  ;;  %v1358_v11 = vpop.f32.mrf.mxu2 }
 0x4af   : > { %v1301_v13 = vmul.f32 0.17677669, %v1297_v10 }
 0x4b1   : > { %v1302_v15 = vsel %vm4139_vm10, %v1301_v13, -3.4028235e+38 }
 0x4b2   : > { %v1303_v17 = vsel %vm1243_vm11, %v1302_v15, -inf }
 0x4b3   : > { %1501 = vmax.xlane.f32.xlu2 %v1500_v16  ;;  %1304 = vmax.xlane.f32.xlu1 %v1303_v17 }
 0x4b6   : > { %v1299_v18 = vpop.f32.mrf.mxu3 }
 0x4be   : > { %v1414_v19 = vpop.f32.mrf.mxu3 }
 0x4bf   : > { %v1418_v20 = vmul.f32 0.17677669, %v1414_v19 }
 0x4c1   : > { %v1419_v21 = vsel %vm4139_vm10, %v1418_v20, -3.4028235e+38  ;;  %v1516_v20 = vsel %vm1259_vm8, %v1474_v63, 0 }
 0x4c2   : > { %v1420_v22 = vsel %vm1243_vm11, %v1419_v21, -inf }
 0x4c3   : > { %1421 = vmax.xlane.f32.xlu0 %v1420_v22 }
 0x4c6   : > { %v1416_v23 = vpop.f32.mrf.mxu3 }
 0x4ce   : > { %v1552_v24 = vpop.f32.mrf.mxu3 }
 0x4cf   : > { %v1556_v25 = vmul.f32 0.17677669, %v1552_v24 }
 0x4d1   : > { %v1557_v26 = vsel %vm4149_vm13, %v1556_v25, -3.4028235e+38 }
 0x4d2   : > { %v1558_v27 = vsel %vm1243_vm11, %v1557_v26, -inf }
 0x4d3   : > { %1559 = vmax.xlane.f32.xlu1 %v1558_v27 }
 0x4d6   : > { %v1554_v29 = vpop.f32.mrf.mxu3 }
 0x4d7   : > { %1316 = vrot.lane.b32.xlu0 %v4131_v12, %s3667_s8 }
 0x4de   : > { %v1669_v30 = vpop.f32.mrf.mxu3 }
 0x4df   : > { %v1673_v43 = vmul.f32 0.17677669, %v1669_v30 }
 0x4e1   : > { %v1674_v46 = vsel %vm4149_vm13, %v1673_v43, -3.4028235e+38 }
 0x4e2   : > { %v1675_v52 = vsel %vm1243_vm11, %v1674_v46, -inf }
 0x4e6   : > { %v1671_v31 = vpop.f32.mrf.mxu3 }
 0x4ec   : > { %1432 = vrot.lane.b32.xlu1 %v4131_v12, %s3668_s9 }
 0x51e   : > { %v1364_v28 = vpop.xlane.xlu2 %1363 }
 0x51f   : > { %v1365_v32 = vsub.f32 %v1361_v6, %v1364_v28 }
 0x521   : > { %v1366_v33 = vmul.f32 1.442695, %v1365_v32 }
 0x523   : > { %3191 = vpow2.f32 %v1366_v33 }
 0x526   : > { %v1502_v34 = vpop.xlane.xlu2 %1501  ;;  %v1305_v35 = vpop.xlane.xlu1 %1304 }
 0x527   : > { %v1503_v36 = vsub.f32 %v1499_v14, %v1502_v34  ;;  %v1306_v37 = vsub.f32 %v1302_v15, %v1305_v35 }
 0x529   : > { %v3192_v38 = vpop.eup %3191  ;;  %v1504_v39 = vmul.f32 1.442695, %v1503_v36  ;;  %v1307_v40 = vmul.f32 1.442695, %v1306_v37 }
 0x52a   : > { %v1368_v42 = vsel %vm1243_vm11, %v3192_v38, 0.0 }
 0x52b   : > { %3193 = vpow2.f32 %v1504_v39  ;;  %1369 = vadd.xlane.f32.xlu2 %v1368_v42 }
 0x52c   : > { %3195 = vpow2.f32 %v1307_v40 }
 0x531   : > { %v4194_v47 = vpop.eup %3193 }
 0x532   : > { %v3196_v50 = vpop.eup %3195  ;;  %v1506_v51 = vsel %vm1243_vm11, %v4194_v47, 0.0 }
 0x533   : > { %1507 = vadd.xlane.f32.xlu0 %v1506_v51  ;;  %v1309_v53 = vsel %vm1243_vm11, %v3196_v50, 0.0  ;;  %1676 = vmax.xlane.f32.xlu2 %v1675_v52 }
 0x534   : > { %1310 = vadd.xlane.f32.xlu1 %v1309_v53 }
 0x536   : > { %v1422_v54 = vpop.xlane.xlu0 %1421 }
 0x537   : > { %v1423_v55 = vsub.f32 %v1419_v21, %v1422_v54 }
 0x539   : > { %v1424_v57 = vmul.f32 1.442695, %v1423_v55 }
 0x53b   : > { %3197 = vpow2.f32 %v1424_v57 }
 0x541   : > { %v3198_v58 = vpop.eup %3197 }
 0x542   : > { %v1426_v48 = vsel %vm1243_vm11, %v3198_v58, 0.0 }
 0x543   : > { %1427 = vadd.xlane.f32.xlu1 %v1426_v48 }
 0x546   : > { %v1560_v62 = vpop.xlane.xlu1 %1559 }
 0x547   : > { %v1561_v4 = vsub.f32 %v1557_v26, %v1560_v62 }
 0x549   : > { %v1317_v59 = vpop.permute.xlu0 %1316  ;;  %v1562_v5 = vmul.f32 1.442695, %v1561_v4 }
 0x54a   : > { %v1322_v60 = vsel %vm1259_vm8, %v1317_v59, 0 }
 0x54b   : > { %1331 = vmatpush.bf16.msrb.mxu0 %v1322_v60  ;;  %1374 = vrot.lane.b32.xlu2 %v4131_v12, %s3666_s3  ;;  %3199 = vpow2.f32 %v1562_v5  ;;  %v1620_v12 = vsub.f32 %v4155_v49, %v1619_v45 }
 0x54d   : > { %v1621_v56 = vmul.f32 1.442695, %v1620_v12  ;;  %v2975_v12 = vld [vmem:[%s4012_s27 + $0x38] sm:$0xff] }
 0x54e   : > { %1792 = vmatpush.bf16.msrb.mxu1 %v2975_v12  ;;  %v2820_v12 = vld [vmem:[%s4015_s4 + $0x58] sm:$0xf0] }
 0x54f   : > { %3201 = vpow2.f32 %v1621_v56 }
 0x551   : > { %v3200_v6 = vpop.eup %3199 }
 0x552   : > { %v1564_v7 = vsel %vm1243_vm11, %v3200_v6, 0.0 }
 0x555   : > { %v4211_v9 = vpop.eup %3201 }
 0x556   : > { %v1623_v1 = vsel %vm1243_vm11, %v4211_v9, 0.0 }
 0x55c   : > { %1571 = vrot.lane.b32.xlu1 %v1474_v63, %s3667_s8 }
 0x55e   : > { %v1433_v0 = vpop.permute.xlu1 %1432 }
 0x55f   : > { %v1438_v3 = vsel %vm1259_vm8, %v1433_v0, 0 }
 0x560   : > { %1447 = vmatpush.bf16.msra.mxu0 %v1438_v3 }
 0x574   : > { %1565 = vadd.xlane.f32.xlu2 %v1564_v7 }
 0x586   : > { %1624 = vadd.xlane.f32.xlu1 %v1623_v1  ;;  %v2974_v1 = vld [vmem:[%s4012_s27 + $0x30] sm:$0xff] }
 0x587   : > { %1793 = vmatpush.bf16.msrb.mxu1 %v2974_v1  ;;  %v2985_v1 = vld [vmem:[%s4015_s4 + $0x44] sm:$0xf0] }
 0x58c   : > { %1687 = vrot.lane.b32.xlu2 %v1474_v63, %s3668_s9 }
 0x59e   : > { %v1370_v8 = vpop.xlane.xlu2 %1369 }
 0x59f   : > { %3203 = vrcp.f32 %v1370_v8  ;;  %v2973_v8 = vld [vmem:[%s4012_s27 + $0x28] sm:$0xff] }
 0x5a0   : > { %1794 = vmatpush.bf16.msrb.mxu1 %v2973_v8  ;;  %v2984_v8 = vld [vmem:[%s4015_s4 + $0x44] sm:$0xf] }
 0x5a5   : > { %v3204_v15 = vpop.eup %3203 }
 0x5a6   : > { %v1677_v10 = vpop.xlane.xlu2 %1676  ;;  %v1372_v16 = vmul.f32 %v3204_v15, %v3192_v38  ;;  %v1508_v24 = vpop.xlane.xlu0 %1507  ;;  %v2968_v15 = vld [vmem:[%s4012_s27] sm:$0xff] }
 0x5a7   : > { %v1311_v11 = vpop.xlane.xlu1 %1310  ;;  %v1678_v13 = vsub.f32 %v1674_v46, %v1677_v10  ;;  %v2972_v10 = vld [vmem:[%s4012_s27 + $0x20] sm:$0xff] }
 0x5a8   : > { %3205 = vrcp.f32 %v1311_v11  ;;  %v1373_v23 = vpack.c.bf16 %v1372_v16, %v1372_v16  ;;  %1795 = vmatpush.bf16.msrb.mxu1 %v2972_v10  ;;  %v2971_v11 = vld [vmem:[%s4012_s27 + $0x18] sm:$0xff] }
 0x5a9   : > { %v1679_v14 = vmul.f32 1.442695, %v1678_v13  ;;  %v2970_v13 = vld [vmem:[%s4012_s27 + $0x10] sm:$0xff] }
 0x5ab   : > { %3207 = vpow2.f32 %v1679_v14  ;;  %v2969_v14 = vld [vmem:[%s4012_s27 + $0x8] sm:$0xff] }
 0x5ac   : > { %3209 = vrcp.f32 %v1508_v24  ;;  %1796 = vmatpush.bf16.msrb.mxu1 %v2971_v11  ;;  %v2812_v11 = vld [vmem:[%s4015_s4 + $0x48] sm:$0xf0] }
 0x5ae   : > { %v3206_v49 = vpop.eup %3205  ;;  %v1375_v17 = vpop.permute.xlu2 %1374 }
 0x5af   : > { %v1313_v18 = vmul.f32 %v3206_v49, %v3196_v50  ;;  %v1380_v19 = vsel %vm1259_vm8, %v1375_v17, 0 }
 0x5b0   : > { %1389 = vmatpush.bf16.msra.mxu2 %v1380_v19  ;;  %1797 = vmatpush.bf16.msrb.mxu1 %v2970_v13  ;;  %v2815_v13 = vor.u32 %v2984_v8, %v2812_v11  ;;  %v2996_v8 = vld [vmem:[%s4017_s29 + $0x20] sm:$0xff]  ;;  %v2995_v11 = vld [vmem:[%s4017_s29 + $0x18] sm:$0xff] }
 0x5b1   : > { %v3208_v21 = vpop.eup %3207  ;;  %v1314_v22 = vpack.c.bf16 %v1313_v18, %v1313_v18 }
 0x5b2   : > { %v1681_v25 = vsel %vm1243_vm11, %v3208_v21, 0.0  ;;  %v3210_v27 = vpop.eup %3209 }
 0x5b3   : > { %2731 = vmatmul.msk.bf16.vlgmr.msrb.gmra.mxu0 %vm1243_vm11, %v1314_v22  ;;  %1682 = vadd.xlane.f32.xlu0 %v1681_v25  ;;  %v1510_v30 = vmul.f32 %v3210_v27, %v4194_v47 }
 0x5b4   : > { %1525 = vmatpush.bf16.msrb.mxu2 %v1516_v20  ;;  %1798 = vmatpush.bf16.msrb.mxu1 %v2969_v14  ;;  %v2802_v14 = vld [vmem:[%s4015_s4 + $0x30] sm:$0xf] }
 0x5b5   : > { %2733 = vmatmul.msk.bf16.vlgmr.msra.gmra.mxu2 %vm1243_vm11, %v1373_v23  ;;  %v1511_v32 = vpack.c.bf16 %v1510_v30, %v1510_v30 }
 0x5b6   : > { %v1428_v26 = vpop.xlane.xlu1 %1427 }
 0x5b7   : > { %3211 = vrcp.f32 %v1428_v26 }
 0x5b8   : > { %1799 = vmatpush.bf16.msrb.mxu1 %v2968_v15  ;;  %v2983_v15 = vld [vmem:[%s4015_s4 + $0x34] sm:$0xf0] }
 0x5bd   : > { %v3212_v29 = vpop.eup %3211 }
 0x5be   : > { %v1430_v31 = vmul.f32 %v3212_v29, %v3198_v58 }
 0x5c0   : > { %v1431_v28 = vpack.c.bf16 %v1430_v31, %v1430_v31 }
 0x5c3   : > { %2735 = vmatmul.msk.bf16.vlgmr.msra.gmra.mxu0 %vm1243_vm11, %v1431_v28  ;;  %v3181_v28 = vld [vmem:[%s4456_s22] ss:$0 sm:$0xff] }
 0x5c5   : > { %2737 = vmatmul.msk.bf16.vlgmr.msrb.gmra.mxu2 %vm1243_vm11, %v1511_v32 }
 0x5c7   : > { %1629 = vrot.lane.b32.xlu0 %v1474_v63, %s3666_s3 }
 0x5ce   : > { %v1572_v33 = vpop.permute.xlu1 %1571 }
 0x5cf   : > { %v1577_v34 = vsel %vm1259_vm8, %v1572_v33, 0 }
 0x5d0   : > { %1586 = vmatpush.bf16.msrb.mxu0 %v1577_v34 }
 0x5e7   : > { %v1566_v35 = vpop.xlane.xlu2 %1565 }
 0x5e8   : > { %3213 = vrcp.f32 %v1566_v35 }
 0x5ee   : > { %v3214_v36 = vpop.eup %3213 }
 0x5ef   : > { %v1568_v37 = vmul.f32 %v3214_v36, %v3200_v6  ;;  %v1688_v38 = vpop.permute.xlu2 %1687 }
 0x5f0   : > { %v1693_v39 = vsel %vm1259_vm8, %v1688_v38, 0 }
 0x5f1   : > { %v1569_v40 = vpack.c.bf16 %v1568_v37, %v1568_v37  ;;  %1702 = vmatpush.bf16.msra.mxu0 %v1693_v39  ;;  %v3670_v37 = vmov 128.0  }
 0x5f3   : > { %2739 = vmatmul.msk.bf16.vlgmr.msrb.gmra.mxu0 %vm1243_vm11, %v1569_v40 }
 0x5f9   : > { %v1625_v43 = vpop.xlane.xlu1 %1624 }
 0x626   : > { %v1683_v42 = vpop.xlane.xlu0 %1682 }
 0x627   : > { %3215 = vrcp.f32 %v1683_v42 }
 0x628   : > { %3217 = vrcp.f32 %v1625_v43 }
 0x629   : > { %3219 = vrcp.f32 %v3670_v37 }
 0x62d   : > { %v3216_v45 = vpop.eup %3215 }
 0x62e   : > { %v1685_v46 = vmul.f32 %v3216_v45, %v3208_v21  ;;  %v3218_v51 = vpop.eup %3217 }
 0x62f   : > { %v1627_v53 = vmul.f32 %v3218_v51, %v4211_v9  ;;  %v3220_v38 = vpop.eup %3219 }
 0x630   : > { %v1686_v47 = vpack.c.bf16 %v1685_v46, %v1685_v46  ;;  %v1333_v50 = vpop.f32.mrf.mxu0  ;;  %v1815_v39 = vmul.f32 128.0, %v3220_v38  ;;  %vm1819_vm0 = vweird.f32 %v3220_v38 }
 0x631   : > { %v1628_v58 = vpack.c.bf16 %v1627_v53, %v1627_v53 }
 0x632   : > { %2743 = vmatmul.msk.bf16.vlgmr.msra.gmra.mxu0 %vm1243_vm11, %v1686_v47  ;;  %v1816_v40 = vsub.f32 1.0, %v1815_v39 }
 0x634   : > { %v1817_v42 = vmul.f32 %v3220_v38, %v1816_v40 }
 0x636   : > { %v1818_v43 = vadd.f32 %v3220_v38, %v1817_v42 }
 0x638   : > { %v1391_v52 = vpop.f32.mrf.mxu2  ;;  %v1335_v54 = vpop.f32.mrf.mxu0  ;;  %v4253_v45 = vsel %vm1819_vm0, %v3220_v38, %v1818_v43 }
 0x639   : > { %v1630_v55 = vpop.permute.xlu0 %1629  ;;  %v2834_v54 = vld [vmem:[%s4015_s4 + $0x70] sm:$0xf] }
 0x63a   : > { %v1635_v57 = vsel %vm1259_vm8, %v1630_v55, 0  ;;  %v2991_v55 = vld [vmem:[%s4015_s4 + $0x74] sm:$0xf0] }
 0x63b   : > { %1644 = vmatpush.bf16.msra.mxu2 %v1635_v57  ;;  %v2990_v57 = vld [vmem:[%s4015_s4 + $0x74] sm:$0xf] }
 0x63e   : > { %2741 = vmatmul.msk.bf16.vlgmr.msra.gmra.mxu2 %vm1243_vm11, %v1628_v58  ;;  %v2835_v58 = vor.u32 %v2991_v55, %v2834_v54 }
 0x640   : > { %v1393_v48 = vpop.f32.mrf.mxu2  ;;  %v1449_v59 = vpop.f32.mrf.mxu0  ;;  %1970 = vmatpush.bf16.msrb.mxu2 %v2835_v58 }
 0x641   : > { %v2836_v48 = vld [vmem:[%s4015_s4 + $0x78] sm:$0xf0] }
 0x648   : > { %v1527_v60 = vpop.f32.mrf.mxu2  ;;  %v1451_v61 = vpop.f32.mrf.mxu0 }
 0x649   : > { %v2989_v61 = vld [vmem:[%s4015_s4 + $0x64] sm:$0xf0] }
 0x650   : > { %v1529_v62 = vpop.f32.mrf.mxu2 }
 0x651   : > { %v2988_v62 = vld [vmem:[%s4015_s4 + $0x64] sm:$0xf] }
 0x670   : > { %v1588_v63 = vpop.f32.mrf.mxu0 }
 0x671   : > { %v3166_v0 = vpack.i.bf16 %v1588_v63, %v1333_v50 }
 0x673   : > { %3167 = vrot.lane.b32.xlu1 %v3166_v0, %s3668_s9  ;;  %v2828_v0 = vld [vmem:[%s4015_s4 + $0x68] sm:$0xf0] }
 0x678   : > { %v1590_v3 = vpop.f32.mrf.mxu0 }
 0x679   : > { %v2831_v3 = vor.u32 %v2988_v62, %v2828_v0 }
 0x6af   : > { %v1704_v4 = vpop.f32.mrf.mxu0 }
 0x6b0   : > { %v3176_v9 = vpack.i.bf16 %v1704_v4, %v1449_v59  ;;  %v2839_v59 = vor.u32 %v2990_v57, %v2836_v48  ;;  %v2818_v4 = vld [vmem:[%s4015_s4 + $0x50] sm:$0xf] }
 0x6b2   : > { %1984 = vmatpush.bf16.msra.mxu3 %v2839_v59 }
 0x6b6   : > { %1985 = vmatpush.bf16.msra.mxu3 %v2831_v3  ;;  %v3183_v3 = vld [vmem:[%s918_s28] ss:$0 sm:$0xff] }
 0x6b7   : > { %v1706_v5 = vpop.f32.mrf.mxu0 }
 0x6b8   : > { %v2987_v5 = vld [vmem:[%s4015_s4 + $0x54] sm:$0xf0] }
 0x6c1   : > { %v1646_v6 = vpop.f32.mrf.mxu2 }
 0x6c2   : > { %v3171_v7 = vpack.i.bf16 %v1646_v6, %v1391_v52  ;;  %v2986_v6 = vld [vmem:[%s4015_s4 + $0x54] sm:$0xf] }
 0x6c4   : > { %3172 = vrot.lane.b32.xlu0 %v3171_v7, %s3666_s3  ;;  %v2819_v7 = vor.u32 %v2987_v5, %v2818_v4 }
 0x6c9   : > { %v1648_v56 = vpop.f32.mrf.mxu2 }
 0x6ca   : > { %v2823_v56 = vor.u32 %v2986_v6, %v2820_v12  ;;  %v2998_v12 = vld [vmem:[%s4017_s29 + $0x30] sm:$0xff] }
 0x6cc   : > { %3177 = vrot.lane.b32.xlu0 %v3176_v9, %s3667_s8  ;;  %1986 = vmatpush.bf16.msra.mxu3 %v2823_v56  ;;  %v2810_v9 = vld [vmem:[%s4015_s4 + $0x40] sm:$0xf]  ;;  %v3006_v56 = vld [vmem:[%s4017_s29 + $0x70] sm:$0xff] }
 0x6cd   : > { %v2811_v10 = vor.u32 %v2985_v1, %v2810_v9  ;;  %v2997_v9 = vld [vmem:[%s4017_s29 + $0x28] sm:$0xff] }
 0x6ce   : > { %v3005_v1 = vld [vmem:[%s4017_s29 + $0x68] sm:$0xff] }
 0x6d0   : > { %1987 = vmatpush.bf16.msra.mxu3 %v2815_v13  ;;  %v3003_v13 = vld [vmem:[%s4017_s29 + $0x58] sm:$0xff] }
 0x6e5   : > { %v3168_v16 = vpop.permute.xlu1 %3167 }
 0x6e6   : > { %v3170_v17 = vunpack.i.h.bf16 %v3168_v16  ;;  %v3169_v18 = vunpack.i.l.bf16 %v3168_v16  ;;  %v2803_v16 = vor.u32 %v2983_v15, %v2802_v14  ;;  %v2994_v14 = vld [vmem:[%s4017_s29 + $0x10] sm:$0xff] }
 0x6e7   : > { %v3002_v15 = vld [vmem:[%s4017_s29 + $0x50] sm:$0xff] }
 0x6e8   : > { %v1720_v22 = vsel %vm1217_vm7, %v1527_v60, %v3170_v17  ;;  %v1465_v23 = vsel %vm1217_vm7, %v4170_v2, %v3169_v18  ;;  %v2826_v60 = vld [vmem:[%s4015_s4 + $0x60] sm:$0xf]  ;;  %v2804_v17 = vld [vmem:[%s4015_s4 + $0x38] sm:$0xf0] }
 0x6e9   : > { %v2827_v63 = vor.u32 %v2989_v61, %v2826_v60 }
 0x6eb   : > { %1971 = vmatpush.bf16.msrb.mxu2 %v2827_v63 }
 0x6ef   : > { %1972 = vmatpush.bf16.msrb.mxu2 %v2819_v7  ;;  %v3007_v7 = vld [vmem:[%s4017_s29 + $0x78] sm:$0xff] }
 0x6f0   : > { %2182 = vmatpush.bf16.msra.mxu1 %v3007_v7 }
 0x6f3   : > { %1973 = vmatpush.bf16.msrb.mxu2 %v2811_v10  ;;  %v3004_v10 = vld [vmem:[%s4017_s29 + $0x60] sm:$0xff] }
 0x6f4   : > { %2183 = vmatpush.bf16.msra.mxu1 %v3006_v56 }
 0x6f7   : > { %1974 = vmatpush.bf16.msrb.mxu2 %v2803_v16  ;;  %v3001_v16 = vld [vmem:[%s4017_s29 + $0x48] sm:$0xff] }
 0x6f8   : > { %2184 = vmatpush.bf16.msra.mxu1 %v3005_v1 }
 0x6fc   : > { %2185 = vmatpush.bf16.msra.mxu1 %v3004_v10 }
 0x700   : > { %2186 = vmatpush.bf16.msra.mxu1 %v3003_v13 }
 0x704   : > { %2187 = vmatpush.bf16.msra.mxu1 %v3002_v15 }
 0x708   : > { %2188 = vmatpush.bf16.msra.mxu1 %v3001_v16 }
 0x736   : > { %v3173_v49 = vpop.permute.xlu0 %3172 }
 0x737   : > { %v3175_v19 = vunpack.i.h.bf16 %v3173_v49  ;;  %v3174_v20 = vunpack.i.l.bf16 %v3173_v49  ;;  %v2982_v49 = vld [vmem:[%s4015_s4 + $0x34] sm:$0xf] }
 0x738   : > { %v2807_v18 = vor.u32 %v2982_v49, %v2804_v17  ;;  %v2993_v49 = vld [vmem:[%s4017_s29 + $0x8] sm:$0xff]  ;;  %v1884_v17 = vld [vmem:[%s4043_s15] sm:$0x3] }
 0x739   : > { %v1467_v26 = vsel %vm1466_vm14, %v1465_v23, %v3174_v20  ;;  %v1721_v27 = vsel %vm1466_vm14, %v1720_v22, %v3175_v19  ;;  %v2794_v19 = vld [vmem:[%s4015_s4 + $0x20] sm:$0xf]  ;;  %v2981_v20 = vld [vmem:[%s4015_s4 + $0x24] sm:$0xf0]  ;;  %v2796_v23 = vld [vmem:[%s4015_s4 + $0x28] sm:$0xf0] }
 0x73a   : > { %1988 = vmatpush.bf16.msra.mxu3 %v2807_v18  ;;  %v2795_v22 = vor.u32 %v2981_v20, %v2794_v19  ;;  %v2992_v18 = vld [vmem:[%s4017_s29] sm:$0xff]  ;;  %v1886_v20 = vperm.slane %v1884_v17, 0 }
 0x73b   : > { %v3000_v19 = vld [vmem:[%s4017_s29 + $0x40] sm:$0xff] }
 0x73c   : > { %1975 = vmatpush.bf16.msrb.mxu2 %v2795_v22  ;;  %2189 = vmatpush.bf16.msra.mxu1 %v3000_v19 }
 0x73e   : > { %v3178_v21 = vpop.permute.xlu0 %3177 }
 0x73f   : > { %v3180_v24 = vunpack.i.h.bf16 %v3178_v21  ;;  %v3179_v25 = vunpack.i.l.bf16 %v3178_v21  ;;  %v2980_v21 = vld [vmem:[%s4015_s4 + $0x24] sm:$0xf] }
 0x741   : > { %v1722_v29 = vsel %vm1468_vm15, %v1721_v27, %v3180_v24  ;;  %v1469_v30 = vsel %vm1468_vm15, %v1467_v26, %v3179_v25  ;;  %v2799_v24 = vor.u32 %v2980_v21, %v2796_v23  ;;  %v2786_v25 = vld [vmem:[%s4015_s4 + $0x10] sm:$0xf]  ;;  %v2979_v26 = vld [vmem:[%s4015_s4 + $0x14] sm:$0xf0]  ;;  %v2978_v27 = vld [vmem:[%s4015_s4 + $0x14] sm:$0xf] }
 0x742   : > { %v1723_v31 = vpack.c.bf16 %v1722_v29, %v1469_v30  ;;  %v2787_v29 = vor.u32 %v2979_v26, %v2786_v25  ;;  %v2788_v30 = vld [vmem:[%s4015_s4 + $0x18] sm:$0xf0]  ;;  %v1887_v21 = vperm.slane %v1884_v17, 1 }
 0x743   : > { %1989 = vmatpush.bf16.msra.mxu3 %v2799_v24 }
 0x744   : > { %1800 = vmatmul.bf16.vlgmr.msrb.gmra.mxu1 %v1723_v31  ;;  %v2778_v31 = vld [vmem:[%s4015_s4] sm:$0xf]  ;;  %1976 = vmatpush.bf16.msrb.mxu2 %v2787_v29 }
 0x7c1   : > { %v1801_v32 = vpop.f32.mrf.mxu1 }
 0x7c2   : > { %v1802_v33 = vadd.f32 %v3181_v28, %v1801_v32 }
 0x7c4   : > { %v1806_v34 = vadd.f32 %v1802_v33, %v4097_v41  ;;  %v2791_v33 = vor.u32 %v2978_v27, %v2788_v30 }
 0x7c6   : > { %1810 = vadd.xlane.f32.xlu2 %v1806_v34  ;;  %1990 = vmatpush.bf16.msra.mxu3 %v2791_v33 }
 0x7c9   : > { %v1803_v35 = vpop.f32.mrf.mxu1 }
 0x7ca   : > { %v1804_v2 = vadd.f32 %v3181_v28, %v1803_v35  ;;  %v2977_v28 = vld [vmem:[%s4015_s4 + $0x4] sm:$0xf0]  ;;  %v2780_v35 = vld [vmem:[%s4015_s4 + $0x8] sm:$0xf0] }
 0x7cc   : > { %v1807_v36 = vadd.f32 %v1804_v2, %v4099_v44 }
 0x7ce   : > { %1812 = vadd.xlane.f32.xlu0 %v1807_v36 }
 0x839   : > { %v1811_v41 = vpop.xlane.xlu2 %1810 }
 0x83a   : > { %v1821_v46 = vmul.f32 %v4253_v45, %v1811_v41 }
 0x83c   : > { %v4256_v47 = vsub.f32 %v1806_v34, %v1821_v46  ;;  %v2976_v34 = vld [vmem:[%s4015_s4 + $0x4] sm:$0xf]  ;;  %s4457_s4 = scalar_lea.vmem [#allocation14], %s3998_s2 }
 0x83d   : > { %v2783_v37 = vor.u32 %v2976_v34, %v2780_v35  ;;  %v3182_v60 = vld [vmem:[%s4457_s4] ss:$0 sm:$0xff] }
 0x83e   : > { %v1825_v44 = vmul.f32 %v4256_v47, %v4256_v47 }
 0x83f   : > { %1991 = vmatpush.bf16.msra.mxu3 %v2783_v37 }
 0x840   : > { %1827 = vadd.xlane.f32.xlu1 %v1825_v44 }
 0x841   : > { %v1813_v50 = vpop.xlane.xlu0 %1812 }
 0x842   : > { %v1822_v51 = vmul.f32 %v4253_v45, %v1813_v50 }
 0x844   : > { %v4261_v52 = vsub.f32 %v1807_v36, %v1822_v51  ;;  %v2779_v36 = vor.u32 %v2977_v28, %v2778_v31 }
 0x846   : > { %v1826_v53 = vmul.f32 %v4261_v52, %v4261_v52  ;;  %1977 = vmatpush.bf16.msrb.mxu2 %v2779_v36 }
 0x848   : > { %1829 = vadd.xlane.f32.xlu2 %v1826_v53 }
 0x8b3   : > { %v1828_v32 = vpop.xlane.xlu1 %1827 }
 0x8b4   : > { %v1831_v2 = vmul.f32 %v1828_v32, %v4253_v45 }
 0x8b6   : > { %v1833_v38 = vadd.f32 1e-12, %v1831_v2 }
 0x8b8   : > { %3221 = vrsqrt.f32 %v1833_v38  ;;  %vm1841_vm2 = vweird.f32 %v1833_v38 }
 0x8bb   : > { %v1830_v39 = vpop.xlane.xlu2 %1829 }
 0x8bc   : > { %v1832_v40 = vmul.f32 %v1830_v39, %v4253_v45 }
 0x8be   : > { %v3222_v42 = vpop.eup %3221  ;;  %v1834_v43 = vadd.f32 1e-12, %v1832_v40 }
 0x8bf   : > { %v1836_v41 = vmul.f32 %v3222_v42, %v1833_v38  ;;  %vm1842_vm1 = vweird.f32 %v3222_v42 }
 0x8c0   : > { %3223 = vrsqrt.f32 %v1834_v43  ;;  %vm1843_vm3 = vmor %vm1841_vm2, %vm1842_vm1  ;;  %vm1851_vm5 = vweird.f32 %v1834_v43 }
 0x8c1   : > { %v1837_v46 = vmul.f32 %v3222_v42, %v1836_v41 }
 0x8c3   : > { %v1838_v44 = vmul.f32 0.5, %v1837_v46 }
 0x8c5   : > { %v1839_v50 = vsub.f32 1.5, %v1838_v44 }
 0x8c6   : > { %v3224_v51 = vpop.eup %3223 }
 0x8c7   : > { %v1840_v53 = vmul.f32 %v3222_v42, %v1839_v50  ;;  %v1846_v54 = vmul.f32 %v3224_v51, %v1834_v43  ;;  %vm1852_vm4 = vweird.f32 %v3224_v51 }
 0x8c8   : > { %vm1853_vm6 = vmor %vm1851_vm5, %vm1852_vm4 }
 0x8c9   : > { %v1847_v55 = vmul.f32 %v3224_v51, %v1846_v54  ;;  %v1844_v57 = vsel %vm1843_vm3, %v3222_v42, %v1840_v53 }
 0x8ca   : > { %v1855_v59 = vmul.f32 %v1844_v57, %v4256_v47 }
 0x8cb   : > { %v1848_v58 = vmul.f32 0.5, %v1847_v55 }
 0x8cc   : > { %v1860_v0 = vmul.f32 %v3182_v60, %v1855_v59 }
 0x8cd   : > { %v1849_v48 = vsub.f32 1.5, %v1848_v58 }
 0x8ce   : > { %v4308_v4 = vadd.f32 %v3183_v3, %v1860_v0 }
 0x8cf   : > { %v1850_v61 = vmul.f32 %v3224_v51, %v1849_v48 }
 0x8d1   : > { %v1854_v62 = vsel %vm1853_vm6, %v3224_v51, %v1850_v61 }
 0x8d2   : > { %v1856_v63 = vmul.f32 %v1854_v62, %v4261_v52  ;;  %v2999_v52 = vld [vmem:[%s4017_s29 + $0x38] sm:$0xff] }
 0x8d3   : > { %2168 = vmatpush.bf16.msrb.mxu0 %v2999_v52 }
 0x8d4   : > { %v1861_v47 = vmul.f32 %v3182_v60, %v1856_v63 }
 0x8d6   : > { %v4310_v5 = vadd.f32 %v3183_v3, %v1861_v47 }
 0x8d7   : > { %2169 = vmatpush.bf16.msrb.mxu0 %v2998_v12 }
 0x8d8   : > { %v1867_v6 = vpack.c.bf16 %v4310_v5, %v4308_v4 }
 0x8da   : > { %1978 = vmatmul.bf16.vlgmr.msrb.gmra.mxu2 %v1867_v6  ;;  %1992 = vmatmul.bf16.vlgmr.msra.gmra.mxu3 %v1867_v6 }
 0x8db   : > { %2170 = vmatpush.bf16.msrb.mxu0 %v2997_v9  ;;  %v3184_v9 = vld [vmem:[%s925_s11] ss:$0 sm:$0xff] }
 0x8df   : > { %2171 = vmatpush.bf16.msrb.mxu0 %v2996_v8 }
 0x8e3   : > { %2172 = vmatpush.bf16.msrb.mxu0 %v2995_v11 }
 0x8e7   : > { %2173 = vmatpush.bf16.msrb.mxu0 %v2994_v14 }
 0x8eb   : > { %2174 = vmatpush.bf16.msrb.mxu0 %v2993_v49 }
 0x8ef   : > { %2175 = vmatpush.bf16.msrb.mxu0 %v2992_v18 }
 0x95d   : > { %v1979_v22 = vpop.f32.mrf.mxu2  ;;  %v1993_v23 = vpop.f32.mrf.mxu3 }
 0x95e   : > { %v1980_v24 = vadd.f32 %v1979_v22, %v1886_v20  ;;  %v1994_v25 = vadd.f32 %v1993_v23, %v1887_v21 }
 0x960   : > { %v2002_v26 = vmul.f32 0.044715, %v1980_v24  ;;  %v2003_v27 = vmul.f32 0.044715, %v1994_v25  ;;  %v1998_v60 = vmul.f32 0.5, %v1980_v24  ;;  %v1999_v63 = vmul.f32 0.5, %v1994_v25 }
 0x962   : > { %v2006_v29 = vmul.f32 %v2002_v26, %v1980_v24  ;;  %v2007_v30 = vmul.f32 %v2003_v27, %v1994_v25 }
 0x964   : > { %v2010_v31 = vmul.f32 %v2006_v29, %v1980_v24  ;;  %v2011_v28 = vmul.f32 %v2007_v30, %v1994_v25 }
 0x965   : > { %v1981_v32 = vpop.f32.mrf.mxu2  ;;  %v1995_v33 = vpop.f32.mrf.mxu3 }
 0x966   : > { %v2014_v34 = vadd.f32 %v2010_v31, %v1980_v24  ;;  %v1982_v35 = vadd.f32 %v1981_v32, %v1886_v20  ;;  %v1996_v2 = vadd.f32 %v1995_v33, %v1887_v21  ;;  %v2015_v36 = vadd.f32 %v2011_v28, %v1994_v25 }
 0x968   : > { %v2004_v37 = vmul.f32 0.044715, %v1982_v35  ;;  %v2005_v38 = vmul.f32 0.044715, %v1996_v2  ;;  %v2018_v39 = vmul.f32 0.7978846, %v2014_v34 }
 0x969   : > { %v2019_v42 = vmul.f32 0.7978846, %v2015_v36  ;;  %v2000_v61 = vmul.f32 0.5, %v1982_v35  ;;  %v2001_v0 = vmul.f32 0.5, %v1996_v2 }
 0x96a   : > { %v2008_v40 = vmul.f32 %v2004_v37, %v1982_v35  ;;  %v2009_v43 = vmul.f32 %v2005_v38, %v1996_v2  ;;  %3225 = vtanh.f32 %v2018_v39  ;;  %v3185_v37 = vld [vmem:[%s928_s6] ss:$0 sm:$0xff] }
 0x96b   : > { %3227 = vtanh.f32 %v2019_v42  ;;  %v3186_v39 = vld [vmem:[%s931_s10] ss:$0 sm:$0xff] }
 0x96c   : > { %v2012_v41 = vmul.f32 %v2008_v40, %v1982_v35  ;;  %v2013_v46 = vmul.f32 %v2009_v43, %v1996_v2 }
 0x96e   : > { %v2016_v44 = vadd.f32 %v2012_v41, %v1982_v35  ;;  %v2017_v50 = vadd.f32 %v2013_v46, %v1996_v2 }
 0x970   : > { %v2020_v51 = vmul.f32 0.7978846, %v2016_v44  ;;  %v2021_v53 = vmul.f32 0.7978846, %v2017_v50  ;;  %v3226_v54 = vpop.eup %3225 }
 0x971   : > { %v3228_v55 = vpop.eup %3227  ;;  %v2026_v57 = vadd.f32 1.0, %v3226_v54 }
 0x972   : > { %3229 = vtanh.f32 %v2020_v51  ;;  %v2027_v48 = vadd.f32 1.0, %v3228_v55 }
 0x973   : > { %3231 = vtanh.f32 %v2021_v53  ;;  %v2030_v47 = vmul.f32 %v2026_v57, %v1998_v60 }
 0x974   : > { %v2031_v52 = vmul.f32 %v2027_v48, %v1999_v63 }
 0x978   : > { %v3230_v58 = vpop.eup %3229 }
 0x979   : > { %v3232_v59 = vpop.eup %3231  ;;  %v2028_v62 = vadd.f32 1.0, %v3230_v58 }
 0x97a   : > { %v2029_v3 = vadd.f32 1.0, %v3232_v59 }
 0x97b   : > { %v2032_v6 = vmul.f32 %v2028_v62, %v2000_v61 }
 0x97c   : > { %v2033_v7 = vmul.f32 %v2029_v3, %v2001_v0 }
 0x97d   : > { %v2034_v12 = vpack.c.bf16 %v2032_v6, %v2030_v47 }
 0x97e   : > { %v2035_v56 = vpack.c.bf16 %v2033_v7, %v2031_v52 }
 0x97f   : > { %2176 = vmatmul.bf16.vlgmr.msrb.gmra.mxu0 %v2034_v12 }
 0x980   : > { %2190 = vmatmul.bf16.vlgmr.msra.gmra.mxu1 %v2035_v56 }
 0x9fc   : > { %v2177_v1 = vpop.f32.mrf.mxu0 }
 0x9fd   : > { %v2178_v8 = vadd.f32 %v3184_v9, %v2177_v1  ;;  %v2191_v10 = vpop.f32.mrf.mxu1 }
 0x9ff   : > { %v2192_v11 = vadd.f32 %v2191_v10, %v2178_v8 }
 0xa01   : > { %v2196_v13 = vadd.f32 %v2192_v11, %v4308_v4 }
 0xa03   : > { %2200 = vadd.xlane.f32.xlu0 %v2196_v13 }
 0xa04   : > { %v2179_v14 = vpop.f32.mrf.mxu0 }
 0xa05   : > { %v2180_v15 = vadd.f32 %v3184_v9, %v2179_v14  ;;  %v2193_v49 = vpop.f32.mrf.mxu1 }
 0xa07   : > { %v2194_v16 = vadd.f32 %v2193_v49, %v2180_v15 }
 0xa09   : > { %v2197_v17 = vadd.f32 %v2194_v16, %v4310_v5 }
 0xa0b   : > { %2202 = vadd.xlane.f32.xlu2 %v2197_v17 }
 0xa76   : > { %v2201_v18 = vpop.xlane.xlu0 %2200 }
 0xa77   : > { %v2204_v19 = vmul.f32 %v2201_v18, %v4253_v45 }
 0xa79   : > { %v2206_v20 = vsub.f32 %v2196_v13, %v2204_v19 }
 0xa7b   : > { %v2208_v21 = vmul.f32 %v2206_v20, %v2206_v20 }
 0xa7d   : > { %2210 = vadd.xlane.f32.xlu1 %v2208_v21 }
 0xa7e   : > { %v2203_v22 = vpop.xlane.xlu2 %2202 }
 0xa7f   : > { %v2205_v23 = vmul.f32 %v2203_v22, %v4253_v45 }
 0xa81   : > { %v2207_v24 = vsub.f32 %v2197_v17, %v2205_v23 }
 0xa83   : > { %v2209_v25 = vmul.f32 %v2207_v24, %v2207_v24 }
 0xa85   : > { %2212 = vadd.xlane.f32.xlu0 %v2209_v25 }
 0xaf0   : > { %v2211_v4 = vpop.xlane.xlu1 %2210 }
 0xaf1   : > { %v2214_v26 = vmul.f32 %v2211_v4, %v4253_v45 }
 0xaf3   : > { %v2216_v27 = vadd.f32 1e-12, %v2214_v26 }
 0xaf5   : > { %3233 = vrsqrt.f32 %v2216_v27  ;;  %vm2224_vm8 = vweird.f32 %v2216_v27 }
 0xaf8   : > { %v2213_v5 = vpop.xlane.xlu0 %2212 }
 0xaf9   : > { %v2215_v29 = vmul.f32 %v2213_v5, %v4253_v45 }
 0xafb   : > { %v3234_v30 = vpop.eup %3233  ;;  %v2217_v31 = vadd.f32 1e-12, %v2215_v29 }
 0xafc   : > { %v2219_v28 = vmul.f32 %v3234_v30, %v2216_v27  ;;  %vm2225_vm7 = vweird.f32 %v3234_v30 }
 0xafd   : > { %3235 = vrsqrt.f32 %v2217_v31  ;;  %vm2226_vm9 = vmor %vm2224_vm8, %vm2225_vm7  ;;  %vm2234_vm11 = vweird.f32 %v2217_v31 }
 0xafe   : > { %v2220_v32 = vmul.f32 %v3234_v30, %v2219_v28 }
 0xb00   : > { %v2221_v33 = vmul.f32 0.5, %v2220_v32 }
 0xb02   : > { %v2222_v34 = vsub.f32 1.5, %v2221_v33 }
 0xb03   : > { %v3236_v35 = vpop.eup %3235 }
 0xb04   : > { %v2223_v2 = vmul.f32 %v3234_v30, %v2222_v34  ;;  %v2229_v36 = vmul.f32 %v3236_v35, %v2217_v31  ;;  %vm2235_vm10 = vweird.f32 %v3236_v35 }
 0xb05   : > { %vm2236_vm12 = vmor %vm2234_vm11, %vm2235_vm10 }
 0xb06   : > { %v2227_v45 = vsel %vm2226_vm9, %v3234_v30, %v2223_v2  ;;  %v2230_v38 = vmul.f32 %v3236_v35, %v2229_v36 }
 0xb07   : > { %v2238_v40 = vmul.f32 %v2227_v45, %v2206_v20 }
 0xb08   : > { %v2231_v42 = vmul.f32 0.5, %v2230_v38 }
 0xb09   : > { %v2243_v43 = vmul.f32 %v3185_v37, %v2238_v40 }
 0xb0a   : > { %v2232_v41 = vsub.f32 1.5, %v2231_v42 }
 0xb0b   : > { %v2248_v46 = vadd.f32 %v3186_v39, %v2243_v43 }
 0xb0c   : > { %v2233_v44 = vmul.f32 %v3236_v35, %v2232_v41 }
 0xb0d   : > { %2250 = vst [vmem:[#allocation2] sm:$0xff] %v2248_v46 }
 0xb0e   : > { %v2237_v50 = vsel %vm2236_vm12, %v3236_v35, %v2233_v44 }
 0xb0f   : > { %v2239_v51 = vmul.f32 %v2237_v50, %v2207_v24 }
 0xb11   : > { %v2244_v53 = vmul.f32 %v3185_v37, %v2239_v51  ;;  %2255 = sbr.rel (%p2904_p1) target bundleno = 3004 (0xbbc), region = 144 }
 0xb13   : > { %v2249_v54 = vadd.f32 %v3186_v39, %v2244_v53 }
 0xb15   : > { %2251 = vst [vmem:[#allocation2 + $0x8] sm:$0xff] %v2249_v54 }
 0xb16   : > { %v3015_v55 = vld [vmem:[#allocation17 + $0x38] sm:$0xff]  ;;  %v3014_v57 = vld [vmem:[#allocation17 + $0x30] sm:$0xff]  ;;  %v3013_v58 = vld [vmem:[#allocation17 + $0x28] sm:$0xff]  ;;  %v2257_v62 = vrot.slane %v2249_v54, 7  ;;  %vm2259_vm13 = vcmask 1040384  }
 0xb17   : > { %2330 = vmatpush.bf16.msra.mxu0 %v3015_v55  ;;  %v3012_v48 = vld [vmem:[#allocation17 + $0x20] sm:$0xff]  ;;  %v3011_v59 = vld [vmem:[#allocation17 + $0x18] sm:$0xff]  ;;  %v3010_v60 = vld [vmem:[#allocation17 + $0x10] sm:$0xff] }
 0xb18   : > { %v3009_v61 = vld [vmem:[#allocation17 + $0x8] sm:$0xff]  ;;  %v3008_v63 = vld [vmem:[#allocation17] sm:$0xff]  ;;  %v2260_v0 = vsel %vm2259_vm13, %v2248_v46, %v2257_v62  ;;  %v3237_v47 = vld [vmem:[%s4462_s21] ss:$0 sm:$0xff] }
 0xb19   : > { %v2261_v3 = vpack.c.bf16 %v2260_v0, %v2260_v0 }
 0xb1b   : > { %2331 = vmatpush.bf16.msra.mxu0 %v3014_v57 }
 0xb1f   : > { %2332 = vmatpush.bf16.msra.mxu0 %v3013_v58 }
 0xb23   : > { %2333 = vmatpush.bf16.msra.mxu0 %v3012_v48 }
 0xb27   : > { %2334 = vmatpush.bf16.msra.mxu0 %v3011_v59 }
 0xb2b   : > { %2335 = vmatpush.bf16.msra.mxu0 %v3010_v60 }
 0xb2f   : > { %2336 = vmatpush.bf16.msra.mxu0 %v3009_v61 }
 0xb33   : > { %2337 = vmatpush.bf16.msra.mxu0 %v3008_v63 }
 0xb36   : > { %2338 = vmatmul.bf16.vlgmr.msra.gmra.mxu0 %v2261_v3 }
 0xbb3   : > { %v2339_v6 = vpop.f32.mrf.mxu0 }
 0xbb4   : > { %v2340_v52 = vadd.f32 %v3237_v47, %v2339_v6 }
 0xbb6   : > { %2343 = vst [vmem:[#allocation18] sm:$0x3] %v2340_v52 }
 0xbbb   : > { %v2341_v7 = vpop.f32.mrf.mxu0 }
 0xbbc PF: > { %p3104_p4 = scmp.eq.s32.totalorder %s3786_s0, 1  ;;  %s3671_s5 = smov [#allocation18]  }
 0xbbd   : > { %s2350_s20 = sshll.u32 %s3671_s5, 4  ;;  %s4463_s7 = sld [smem:[#allocation46_spill]]  ;;  %s2351_s20 = int_to_ptr.vmem [resolvable:$true] %s2350_s20 }
 0xbc3   : > { %s2352_s3 = sshll.u32 %s4463_s7, 4  ;;  %s2353_s3 = int_to_ptr.hbm [resolvable:$true] %s2352_s3 }
 0xbc4   : > { %3055 = dma.vmem_to_hbm [thread:$0]  (%p3104_p4), %s2351_s20, 32, %s2353_s3, [#allocation5]  }
 0xbc5   : > { %3633 = dma.done.wait (%p3104_p4), [#allocation5], 32  }
 0xbc6   : > { %3635 = vsyncadd (%p3104_p4), [#allocation5], 4294967264 }
 0xbc7 PF: > { %s4464_s30 = sld [smem:[#allocation28_spill]] }
 0xbc8   : > { %s4465_s27 = sld [smem:[#allocation25_spill]] }
 0xbc9   : > { %s4466_s28 = sld [smem:[#allocation26_spill]] }
 0xbca   : > { %s4467_s29 = sld [smem:[#allocation29_spill]] }
 0xbcd   : > { %p29_p6 = scmp.ge.s32.totalorder %s4464_s30, 4  }
 0xbcf   :  { %31 = sbr.rel (!%p29_p6) target bundleno = 23 (0x17), region = 230 }
 0xbd4   :  { %2366 = vsyncpa [#allocation4], 1 }
 0xbd5   :  { %2368 = vsyncpa [#allocation4 + $0x1], 1 }
 0xbd6   :  { %2369 = vsyncpa [#allocation7], 1 }
 0xbd7   :  { %2370 = vsyncpa [#allocation10], 1 }
 0xbd8   :  { %2371 = vsyncpa [#allocation5], 1 }
 0xbd9   :  { %2373 = vsyncpa [#allocation5 + $0x1], 1 }

</bundles_post_ra>
